<compile_context>
chip_gen: v7x
topology: tpu7x:2x2x1
jax: 0.10.0
libtpu: 0.0.40
codegen_flags: <defaults>
</compile_context>

<pallas_src>
import functools

import jax
import jax.numpy as jnp
from jax.experimental import pallas as pl
from jax.experimental.pallas import tpu as pltpu


def _conv_out_len(n):
    return (n - 3) // 2 + 1


def cnn_kernel(idx_ref, emb_ref, w1_ref, w2_ref, w3_ref, wo_ref, mask_ref,
               out_ref, x_scr, h1_scr, h2_scr, *, Bb, L, L1, L2, L3):
    V = emb_ref.shape[0]

    # ---- embedding lookup as one batched one-hot matmul (exact; V is tiny) ----
    idx = idx_ref[0]                                                   # (Bb*L, 1) int32
    vocab_iota = jax.lax.broadcasted_iota(jnp.int32, (Bb * L, V), 1)
    onehot = (vocab_iota == idx).astype(jnp.float32)                   # (Bb*L, V)
    x_scr[...] = jnp.dot(onehot, emb_ref[...],
                         preferred_element_type=jnp.float32)           # (Bb*L, E)

    # ---- Conv1d(kernel=3, stride=2, VALID) as ONE im2col matmul per sequence;
    #      bias folded via a constant-1 lane appended to the im2col matrix ----
    def conv(src_ref, row0, l_out, wf_ref):
        pieces = [src_ref[pl.ds(row0 + k, l_out, stride=2), :] for k in range(3)]
        pieces.append(jnp.ones((l_out, 1), jnp.float32))
        cols = jnp.concatenate(pieces, axis=-1)                        # (l_out, 3*Cin+1)
        return jnp.dot(cols, wf_ref[...], preferred_element_type=jnp.float32)

    feats = []
    for b in range(Bb):                                                # static unroll
        h1_scr[pl.ds(b * L1, L1), :] = jnp.tanh(conv(x_scr, b * L, L1, w1_ref))
        h2_scr[pl.ds(b * L2, L2), :] = jnp.tanh(conv(h1_scr, b * L1, L2, w2_ref))
        h3 = conv(h2_scr, b * L2, L3, w3_ref)                          # (L3, C)
        # F.max_pool1d over the full remaining length -> (1, C)
        feats.append(jnp.max(h3, axis=0, keepdims=True))

    # ---- dropout (pre-scaled keep mask) + Linear(num_channels -> hidden_dim) ----
    f = jnp.concatenate(feats, axis=0) * mask_ref[0]                   # (Bb, C)
    f_aug = jnp.concatenate([f, jnp.ones((Bb, 1), jnp.float32)], axis=-1)
    out_ref[0] = jnp.dot(f_aug, wo_ref[...],
                         preferred_element_type=jnp.float32)           # (Bb, H) slab


def cnn_forward(tokens, params, drop_mask, *, blocks=1):
    """tokens: (B, L) int32 token ids; drop_mask: (B, C) pre-scaled keep mask.
    Returns (B, hidden_dim) float32 — one module forward per sequence."""
    B, L = tokens.shape
    V, E = params["emb"].shape
    C = params["b1"].shape[-1]
    H = params["bo"].shape[-1]
    assert B % blocks == 0
    Bb = B // blocks
    L1 = _conv_out_len(L)
    L2 = _conv_out_len(L1)
    L3 = _conv_out_len(L2)

    # Host-side fold: (3, Cin, Cout) conv weight + (1, Cout) bias -> (3*Cin + 1, Cout).
    def fold(w, b):
        taps, cin, cout = w.shape
        return jnp.concatenate([w.reshape(taps * cin, cout),
                                b.reshape(1, cout)], axis=0)

    w1f = fold(params["w1"], params["b1"])
    w2f = fold(params["w2"], params["b2"])
    w3f = fold(params["w3"], params["b3"])
    wof = jnp.concatenate([params["wo"], params["bo"].reshape(1, H)], axis=0)

    idx = tokens.astype(jnp.int32).reshape(blocks, Bb * L, 1)
    mask = drop_mask.astype(jnp.float32).reshape(blocks, Bb, C)

    def const(shape):  # VMEM-resident across all grid steps (constant block index)
        n = len(shape)
        return pl.BlockSpec(shape, lambda i, _n=n: (0,) * _n)

    kernel = functools.partial(cnn_kernel, Bb=Bb, L=L, L1=L1, L2=L2, L3=L3)

    out = pl.pallas_call(
        kernel,
        out_shape=jax.ShapeDtypeStruct((blocks, Bb, H), jnp.float32),
        grid=(blocks,),
        in_specs=[
            pl.BlockSpec((1, Bb * L, 1), lambda i: (i, 0, 0)),   # token ids
            const((V, E)),                                        # embedding table
            const((3 * E + 1, C)),                                # conv1 weight (+bias row)
            const((3 * C + 1, C)),                                # conv2 weight (+bias row)
            const((3 * C + 1, C)),                                # conv3 weight (+bias row)
            const((C + 1, H)),                                    # linear weight (+bias row)
            pl.BlockSpec((1, Bb, C), lambda i: (i, 0, 0)),        # dropout keep mask
        ],
        out_specs=pl.BlockSpec((1, Bb, H), lambda i: (i, 0, 0)),
        scratch_shapes=[
            pltpu.VMEM((Bb * L, E), jnp.float32),                 # embedded tokens
            pltpu.VMEM((Bb * L1, C), jnp.float32),                # conv1 activations
            pltpu.VMEM((Bb * L2, C), jnp.float32),                # conv2 activations
        ],
        compiler_params=pltpu.CompilerParams(
            dimension_semantics=("parallel",)),
    )(idx, params["emb"], w1f, w2f, w3f, wof, mask)
    return out.reshape(B, H)


def reference_forward(tokens, params, drop_mask):
    """Pure-JAX reference mirroring the PyTorch module, applied per sequence."""
    def single(tok, mask):
        emb = params["emb"][tok]                                      # (L, E)
        x = emb.T[None]                                               # (1, E, L)  == NCW

        def conv(x, w, b):
            wt = jnp.transpose(w, (2, 1, 0))                          # (Cout, Cin, 3)
            y = jax.lax.conv_general_dilated(
                x, wt, window_strides=(2,), padding="VALID",
                dimension_numbers=("NCH", "OIH", "NCH"),
                precision=jax.lax.Precision.HIGHEST)
            return y + b.reshape(1, -1, 1)

        y = jnp.tanh(conv(x, params["w1"], params["b1"]))
        y = jnp.tanh(conv(y, params["w2"], params["b2"]))
        y = conv(y, params["w3"], params["b3"])
        feats = jnp.max(y, axis=2)                                    # (1, C)
        feats = feats * mask[None, :]
        return (feats @ params["wo"] + params["bo"])[0]               # (H,)

    return jnp.stack([single(tokens[b], drop_mask[b])
                      for b in range(tokens.shape[0])])


def init_params(key, vocab_size, emb_size, num_channels, hidden_dim):
    ks = jax.random.split(key, 9)
    return {
        "emb": jax.random.normal(ks[0], (vocab_size, emb_size), jnp.float32) * 0.1,
        "w1": jax.random.normal(ks[1], (3, emb_size, num_channels), jnp.float32) * 0.1,
        "b1": jax.random.normal(ks[2], (1, num_channels), jnp.float32) * 0.01,
        "w2": jax.random.normal(ks[3], (3, num_channels, num_channels), jnp.float32) * 0.1,
        "b2": jax.random.normal(ks[4], (1, num_channels), jnp.float32) * 0.01,
        "w3": jax.random.normal(ks[5], (3, num_channels, num_channels), jnp.float32) * 0.1,
        "b3": jax.random.normal(ks[6], (1, num_channels), jnp.float32) * 0.01,
        # kaiming-normal-ish init for the output linear, stored as (C, H)
        "wo": jax.random.normal(ks[7], (num_channels, hidden_dim), jnp.float32)
              * jnp.sqrt(2.0 / num_channels),
        "bo": jax.random.normal(ks[8], (1, hidden_dim), jnp.float32) * 0.01,
    }


if __name__ == "__main__":
    vocab_size, emb_size, num_channels, hidden_dim = 50, 32, 16, 32
    dropout_p = 0.25
    batch, seq_len = 4, 32          # conv lengths per sequence: 32 -> 15 -> 7 -> 3

    key = jax.random.PRNGKey(0)
    k_param, k_tok, k_drop = jax.random.split(key, 3)

    params = init_params(k_param, vocab_size, emb_size, num_channels, hidden_dim)
    tokens = jax.random.randint(k_tok, (batch, seq_len), 0, vocab_size, dtype=jnp.int32)

    # Training-mode dropout (F.dropout default): per-sequence pre-scaled keep mask.
    # TODO(synk): PyTorch's internal dropout RNG has no Pallas equivalent; the mask is
    # generated host-side and applied identically in the kernel and the reference.
    keep = jax.random.bernoulli(k_drop, 1.0 - dropout_p, (batch, num_channels))
    drop_mask = keep.astype(jnp.float32) / (1.0 - dropout_p)

    out = cnn_forward(tokens, params, drop_mask)   # blocks=2 would split over v7x cores
    out = jax.block_until_ready(out)

    ref = reference_forward(tokens, params, drop_mask)
    assert out.shape == (batch, hidden_dim)
    assert bool(jnp.all(jnp.isfinite(out)))
    assert bool(jnp.allclose(out, ref, atol=2e-3, rtol=2e-3))

    print("KERNEL_OK")
</pallas_src>

<mosaic_0001>
module attributes {stable_mosaic.version = 11 : i64} {
  func.func @cnn_kernel(%arg0: i32, %arg1: memref<1x128x1xi32, #tpu.memory_space<vmem>>, %arg2: memref<50x32xf32, #tpu.memory_space<vmem>>, %arg3: memref<97x16xf32, #tpu.memory_space<vmem>>, %arg4: memref<49x16xf32, #tpu.memory_space<vmem>>, %arg5: memref<49x16xf32, #tpu.memory_space<vmem>>, %arg6: memref<17x32xf32, #tpu.memory_space<vmem>>, %arg7: memref<1x4x16xf32, #tpu.memory_space<vmem>>, %arg8: memref<1x4x32xf32, #tpu.memory_space<vmem>>, %arg9: memref<128x32xf32, #tpu.memory_space<vmem>>, %arg10: memref<60x16xf32, #tpu.memory_space<vmem>>, %arg11: memref<28x16xf32, #tpu.memory_space<vmem>>) attributes {dimension_semantics = [#tpu.dimension_semantics<parallel>], iteration_bounds = array<i64: 1>, scalar_prefetch = 0 : i64, scratch_operands = 3 : i64, tpu.core_type = #tpu.core_type<tc>, window_params = [{transform_indices = @transform_0, window_bounds = array<i64: 1, 128, 1>}, {pipeline_mode = #tpu.pipeline_mode<synchronous>, transform_indices = @transform_1, window_bounds = array<i64: 50, 32>}, {pipeline_mode = #tpu.pipeline_mode<synchronous>, transform_indices = @transform_2, window_bounds = array<i64: 97, 16>}, {pipeline_mode = #tpu.pipeline_mode<synchronous>, transform_indices = @transform_3, window_bounds = array<i64: 49, 16>}, {pipeline_mode = #tpu.pipeline_mode<synchronous>, transform_indices = @transform_4, window_bounds = array<i64: 49, 16>}, {pipeline_mode = #tpu.pipeline_mode<synchronous>, transform_indices = @transform_5, window_bounds = array<i64: 17, 32>}, {transform_indices = @transform_6, window_bounds = array<i64: 1, 4, 16>}, {transform_indices = @transform_7, window_bounds = array<i64: 1, 4, 32>}]} {
    %c0 = arith.constant 0 : index
    %c0_0 = arith.constant 0 : index
    %c0_1 = arith.constant 0 : index
    %0 = vector.load %arg1[%c0, %c0_0, %c0_1] : memref<1x128x1xi32, #tpu.memory_space<vmem>>, vector<1x128x1xi32>
    %1 = vector.shape_cast %0 : vector<1x128x1xi32> to vector<128x1xi32>
    %2 = tpu.iota {dimensions = array<i32: 1>} : vector<128x50xi32>
    %3 = vector.broadcast %1 : vector<128x1xi32> to vector<128x50xi32>
    %4 = arith.cmpi eq, %2, %3 : vector<128x50xi32>
    %5 = arith.extui %4 : vector<128x50xi1> to vector<128x50xi32>
    %6 = arith.sitofp %5 : vector<128x50xi32> to vector<128x50xf32>
    %c0_2 = arith.constant 0 : index
    %c0_3 = arith.constant 0 : index
    %7 = vector.load %arg2[%c0_2, %c0_3] : memref<50x32xf32, #tpu.memory_space<vmem>>, vector<50x32xf32>
    %cst = arith.constant dense<0.000000e+00> : vector<128x32xf32>
    %8 = tpu.matmul %6, %7, %cst {dimension_numbers = #tpu.dot_dimension_numbers<[1], [0], [0], [1], [0, 0, 1, 1], [], []>} : vector<128x50xf32>, vector<50x32xf32>, vector<128x32xf32> -> vector<128x32xf32>
    %c0_4 = arith.constant 0 : index
    %c0_5 = arith.constant 0 : index
    %9 = vector.load %arg9[%c0_4, %c0_5] : memref<128x32xf32, #tpu.memory_space<vmem>>, vector<128x32xf32>
    tpu.vector_store %arg9[%c0_4, %c0_5], %8 {strides = array<i32>} : memref<128x32xf32, #tpu.memory_space<vmem>>, vector<128x32xf32>,
    %c0_6 = arith.constant 0 : index
    %c0_7 = arith.constant 0 : index
    %10 = tpu.strided_load %arg9[%c0_6, %c0_7] {strides = array<i32: 2, 1>} : memref<128x32xf32, #tpu.memory_space<vmem>>, vector<15x32xf32>
    %c1 = arith.constant 1 : index
    %c0_8 = arith.constant 0 : index
    %11 = tpu.strided_load %arg9[%c1, %c0_8] {strides = array<i32: 2, 1>} : memref<128x32xf32, #tpu.memory_space<vmem>>, vector<15x32xf32>
    %c2 = arith.constant 2 : index
    %c0_9 = arith.constant 0 : index
    %12 = tpu.strided_load %arg9[%c2, %c0_9] {strides = array<i32: 2, 1>} : memref<128x32xf32, #tpu.memory_space<vmem>>, vector<15x32xf32>
    %cst_10 = arith.constant 1.000000e+00 : f32
    %13 = vector.broadcast %cst_10 : f32 to vector<15x1xf32>
    %14 = tpu.concatenate %10, %11, %12, %13 in 1 : vector<15x32xf32>, vector<15x32xf32>, vector<15x32xf32>, vector<15x1xf32> -> vector<15x97xf32>
    %c0_11 = arith.constant 0 : index
    %c0_12 = arith.constant 0 : index
    %15 = vector.load %arg3[%c0_11, %c0_12] : memref<97x16xf32, #tpu.memory_space<vmem>>, vector<97x16xf32>
    %cst_13 = arith.constant dense<0.000000e+00> : vector<15x16xf32>
    %16 = tpu.matmul %14, %15, %cst_13 {dimension_numbers = #tpu.dot_dimension_numbers<[1], [0], [0], [1], [0, 0, 1, 1], [], []>} : vector<15x97xf32>, vector<97x16xf32>, vector<15x16xf32> -> vector<15x16xf32>
    %17 = math.tanh %16 : vector<15x16xf32>
    %c0_14 = arith.constant 0 : index
    %c0_15 = arith.constant 0 : index
    %18 = vector.load %arg10[%c0_14, %c0_15] : memref<60x16xf32, #tpu.memory_space<vmem>>, vector<15x16xf32>
    tpu.vector_store %arg10[%c0_14, %c0_15], %17 {strides = array<i32>} : memref<60x16xf32, #tpu.memory_space<vmem>>, vector<15x16xf32>,
    %c0_16 = arith.constant 0 : index
    %c0_17 = arith.constant 0 : index
    %19 = tpu.strided_load %arg10[%c0_16, %c0_17] {strides = array<i32: 2, 1>} : memref<60x16xf32, #tpu.memory_space<vmem>>, vector<7x16xf32>
    %c1_18 = arith.constant 1 : index
    %c0_19 = arith.constant 0 : index
    %20 = tpu.strided_load %arg10[%c1_18, %c0_19] {strides = array<i32: 2, 1>} : memref<60x16xf32, #tpu.memory_space<vmem>>, vector<7x16xf32>
    %c2_20 = arith.constant 2 : index
    %c0_21 = arith.constant 0 : index
    %21 = tpu.strided_load %arg10[%c2_20, %c0_21] {strides = array<i32: 2, 1>} : memref<60x16xf32, #tpu.memory_space<vmem>>, vector<7x16xf32>
    %cst_22 = arith.constant 1.000000e+00 : f32
    %22 = vector.broadcast %cst_22 : f32 to vector<7x1xf32>
    %23 = tpu.concatenate %19, %20, %21, %22 in 1 : vector<7x16xf32>, vector<7x16xf32>, vector<7x16xf32>, vector<7x1xf32> -> vector<7x49xf32>
    %c0_23 = arith.constant 0 : index
    %c0_24 = arith.constant 0 : index
    %24 = vector.load %arg4[%c0_23, %c0_24] : memref<49x16xf32, #tpu.memory_space<vmem>>, vector<49x16xf32>
    %cst_25 = arith.constant dense<0.000000e+00> : vector<7x16xf32>
    %25 = tpu.matmul %23, %24, %cst_25 {dimension_numbers = #tpu.dot_dimension_numbers<[1], [0], [0], [1], [0, 0, 1, 1], [], []>} : vector<7x49xf32>, vector<49x16xf32>, vector<7x16xf32> -> vector<7x16xf32>
    %26 = math.tanh %25 : vector<7x16xf32>
    %c0_26 = arith.constant 0 : index
    %c0_27 = arith.constant 0 : index
    %27 = vector.load %arg11[%c0_26, %c0_27] : memref<28x16xf32, #tpu.memory_space<vmem>>, vector<7x16xf32>
    tpu.vector_store %arg11[%c0_26, %c0_27], %26 {strides = array<i32>} : memref<28x16xf32, #tpu.memory_space<vmem>>, vector<7x16xf32>,
    %c0_28 = arith.constant 0 : index
    %c0_29 = arith.constant 0 : index
    %28 = tpu.strided_load %arg11[%c0_28, %c0_29] {strides = array<i32: 2, 1>} : memref<28x16xf32, #tpu.memory_space<vmem>>, vector<3x16xf32>
    %c1_30 = arith.constant 1 : index
    %c0_31 = arith.constant 0 : index
    %29 = tpu.strided_load %arg11[%c1_30, %c0_31] {strides = array<i32: 2, 1>} : memref<28x16xf32, #tpu.memory_space<vmem>>, vector<3x16xf32>
    %c2_32 = arith.constant 2 : index
    %c0_33 = arith.constant 0 : index
    %30 = tpu.strided_load %arg11[%c2_32, %c0_33] {strides = array<i32: 2, 1>} : memref<28x16xf32, #tpu.memory_space<vmem>>, vector<3x16xf32>
    %cst_34 = arith.constant 1.000000e+00 : f32
    %31 = vector.broadcast %cst_34 : f32 to vector<3x1xf32>
    %32 = tpu.concatenate %28, %29, %30, %31 in 1 : vector<3x16xf32>, vector<3x16xf32>, vector<3x16xf32>, vector<3x1xf32> -> vector<3x49xf32>
    %c0_35 = arith.constant 0 : index
    %c0_36 = arith.constant 0 : index
    %33 = vector.load %arg5[%c0_35, %c0_36] : memref<49x16xf32, #tpu.memory_space<vmem>>, vector<49x16xf32>
    %cst_37 = arith.constant dense<0.000000e+00> : vector<3x16xf32>
    %34 = tpu.matmul %32, %33, %cst_37 {dimension_numbers = #tpu.dot_dimension_numbers<[1], [0], [0], [1], [0, 0, 1, 1], [], []>} : vector<3x49xf32>, vector<49x16xf32>, vector<3x16xf32> -> vector<3x16xf32>
    %cst_38 = arith.constant dense<0xFF800000> : vector<16xf32>
    %35 = vector.multi_reduction <maximumf>, %34, %cst_38 [0] : vector<3x16xf32> to vector<16xf32>
    %36 = vector.shape_cast %35 : vector<16xf32> to vector<1x16xf32>
    %c32 = arith.constant 32 : index
    %c0_39 = arith.constant 0 : index
    %37 = tpu.strided_load %arg9[%c32, %c0_39] {strides = array<i32: 2, 1>} : memref<128x32xf32, #tpu.memory_space<vmem>>, vector<15x32xf32>
    %c33 = arith.constant 33 : index
    %c0_40 = arith.constant 0 : index
    %38 = tpu.strided_load %arg9[%c33, %c0_40] {strides = array<i32: 2, 1>} : memref<128x32xf32, #tpu.memory_space<vmem>>, vector<15x32xf32>
    %c34 = arith.constant 34 : index
    %c0_41 = arith.constant 0 : index
    %39 = tpu.strided_load %arg9[%c34, %c0_41] {strides = array<i32: 2, 1>} : memref<128x32xf32, #tpu.memory_space<vmem>>, vector<15x32xf32>
    %cst_42 = arith.constant 1.000000e+00 : f32
    %40 = vector.broadcast %cst_42 : f32 to vector<15x1xf32>
    %41 = tpu.concatenate %37, %38, %39, %40 in 1 : vector<15x32xf32>, vector<15x32xf32>, vector<15x32xf32>, vector<15x1xf32> -> vector<15x97xf32>
    %c0_43 = arith.constant 0 : index
    %c0_44 = arith.constant 0 : index
    %42 = vector.load %arg3[%c0_43, %c0_44] : memref<97x16xf32, #tpu.memory_space<vmem>>, vector<97x16xf32>
    %cst_45 = arith.constant dense<0.000000e+00> : vector<15x16xf32>
    %43 = tpu.matmul %41, %42, %cst_45 {dimension_numbers = #tpu.dot_dimension_numbers<[1], [0], [0], [1], [0, 0, 1, 1], [], []>} : vector<15x97xf32>, vector<97x16xf32>, vector<15x16xf32> -> vector<15x16xf32>
    %44 = math.tanh %43 : vector<15x16xf32>
    %c15 = arith.constant 15 : index
    %c0_46 = arith.constant 0 : index
    %45 = vector.load %arg10[%c15, %c0_46] : memref<60x16xf32, #tpu.memory_space<vmem>>, vector<15x16xf32>
    tpu.vector_store %arg10[%c15, %c0_46], %44 {strides = array<i32>} : memref<60x16xf32, #tpu.memory_space<vmem>>, vector<15x16xf32>,
    %c15_47 = arith.constant 15 : index
    %c0_48 = arith.constant 0 : index
    %46 = tpu.strided_load %arg10[%c15_47, %c0_48] {strides = array<i32: 2, 1>} : memref<60x16xf32, #tpu.memory_space<vmem>>, vector<7x16xf32>
    %c16 = arith.constant 16 : index
    %c0_49 = arith.constant 0 : index
    %47 = tpu.strided_load %arg10[%c16, %c0_49] {strides = array<i32: 2, 1>} : memref<60x16xf32, #tpu.memory_space<vmem>>, vector<7x16xf32>
    %c17 = arith.constant 17 : index
    %c0_50 = arith.constant 0 : index
    %48 = tpu.strided_load %arg10[%c17, %c0_50] {strides = array<i32: 2, 1>} : memref<60x16xf32, #tpu.memory_space<vmem>>, vector<7x16xf32>
    %cst_51 = arith.constant 1.000000e+00 : f32
    %49 = vector.broadcast %cst_51 : f32 to vector<7x1xf32>
    %50 = tpu.concatenate %46, %47, %48, %49 in 1 : vector<7x16xf32>, vector<7x16xf32>, vector<7x16xf32>, vector<7x1xf32> -> vector<7x49xf32>
    %c0_52 = arith.constant 0 : index
    %c0_53 = arith.constant 0 : index
    %51 = vector.load %arg4[%c0_52, %c0_53] : memref<49x16xf32, #tpu.memory_space<vmem>>, vector<49x16xf32>
    %cst_54 = arith.constant dense<0.000000e+00> : vector<7x16xf32>
    %52 = tpu.matmul %50, %51, %cst_54 {dimension_numbers = #tpu.dot_dimension_numbers<[1], [0], [0], [1], [0, 0, 1, 1], [], []>} : vector<7x49xf32>, vector<49x16xf32>, vector<7x16xf32> -> vector<7x16xf32>
    %53 = math.tanh %52 : vector<7x16xf32>
    %c7 = arith.constant 7 : index
    %c0_55 = arith.constant 0 : index
    %54 = vector.load %arg11[%c7, %c0_55] : memref<28x16xf32, #tpu.memory_space<vmem>>, vector<7x16xf32>
    tpu.vector_store %arg11[%c7, %c0_55], %53 {strides = array<i32>} : memref<28x16xf32, #tpu.memory_space<vmem>>, vector<7x16xf32>,
    %c7_56 = arith.constant 7 : index
    %c0_57 = arith.constant 0 : index
    %55 = tpu.strided_load %arg11[%c7_56, %c0_57] {strides = array<i32: 2, 1>} : memref<28x16xf32, #tpu.memory_space<vmem>>, vector<3x16xf32>
    %c8 = arith.constant 8 : index
    %c0_58 = arith.constant 0 : index
    %56 = tpu.strided_load %arg11[%c8, %c0_58] {strides = array<i32: 2, 1>} : memref<28x16xf32, #tpu.memory_space<vmem>>, vector<3x16xf32>
    %c9 = arith.constant 9 : index
    %c0_59 = arith.constant 0 : index
    %57 = tpu.strided_load %arg11[%c9, %c0_59] {strides = array<i32: 2, 1>} : memref<28x16xf32, #tpu.memory_space<vmem>>, vector<3x16xf32>
    %cst_60 = arith.constant 1.000000e+00 : f32
    %58 = vector.broadcast %cst_60 : f32 to vector<3x1xf32>
    %59 = tpu.concatenate %55, %56, %57, %58 in 1 : vector<3x16xf32>, vector<3x16xf32>, vector<3x16xf32>, vector<3x1xf32> -> vector<3x49xf32>
    %c0_61 = arith.constant 0 : index
    %c0_62 = arith.constant 0 : index
    %60 = vector.load %arg5[%c0_61, %c0_62] : memref<49x16xf32, #tpu.memory_space<vmem>>, vector<49x16xf32>
    %cst_63 = arith.constant dense<0.000000e+00> : vector<3x16xf32>
    %61 = tpu.matmul %59, %60, %cst_63 {dimension_numbers = #tpu.dot_dimension_numbers<[1], [0], [0], [1], [0, 0, 1, 1], [], []>} : vector<3x49xf32>, vector<49x16xf32>, vector<3x16xf32> -> vector<3x16xf32>
    %cst_64 = arith.constant dense<0xFF800000> : vector<16xf32>
    %62 = vector.multi_reduction <maximumf>, %61, %cst_64 [0] : vector<3x16xf32> to vector<16xf32>
    %63 = vector.shape_cast %62 : vector<16xf32> to vector<1x16xf32>
    %c64 = arith.constant 64 : index
    %c0_65 = arith.constant 0 : index
    %64 = tpu.strided_load %arg9[%c64, %c0_65] {strides = array<i32: 2, 1>} : memref<128x32xf32, #tpu.memory_space<vmem>>, vector<15x32xf32>
    %c65 = arith.constant 65 : index
    %c0_66 = arith.constant 0 : index
    %65 = tpu.strided_load %arg9[%c65, %c0_66] {strides = array<i32: 2, 1>} : memref<128x32xf32, #tpu.memory_space<vmem>>, vector<15x32xf32>
    %c66 = arith.constant 66 : index
    %c0_67 = arith.constant 0 : index
    %66 = tpu.strided_load %arg9[%c66, %c0_67] {strides = array<i32: 2, 1>} : memref<128x32xf32, #tpu.memory_space<vmem>>, vector<15x32xf32>
    %cst_68 = arith.constant 1.000000e+00 : f32
    %67 = vector.broadcast %cst_68 : f32 to vector<15x1xf32>
    %68 = tpu.concatenate %64, %65, %66, %67 in 1 : vector<15x32xf32>, vector<15x32xf32>, vector<15x32xf32>, vector<15x1xf32> -> vector<15x97xf32>
    %c0_69 = arith.constant 0 : index
    %c0_70 = arith.constant 0 : index
    %69 = vector.load %arg3[%c0_69, %c0_70] : memref<97x16xf32, #tpu.memory_space<vmem>>, vector<97x16xf32>
    %cst_71 = arith.constant dense<0.000000e+00> : vector<15x16xf32>
    %70 = tpu.matmul %68, %69, %cst_71 {dimension_numbers = #tpu.dot_dimension_numbers<[1], [0], [0], [1], [0, 0, 1, 1], [], []>} : vector<15x97xf32>, vector<97x16xf32>, vector<15x16xf32> -> vector<15x16xf32>
    %71 = math.tanh %70 : vector<15x16xf32>
    %c30 = arith.constant 30 : index
    %c0_72 = arith.constant 0 : index
    %72 = vector.load %arg10[%c30, %c0_72] : memref<60x16xf32, #tpu.memory_space<vmem>>, vector<15x16xf32>
    tpu.vector_store %arg10[%c30, %c0_72], %71 {strides = array<i32>} : memref<60x16xf32, #tpu.memory_space<vmem>>, vector<15x16xf32>,
    %c30_73 = arith.constant 30 : index
    %c0_74 = arith.constant 0 : index
    %73 = tpu.strided_load %arg10[%c30_73, %c0_74] {strides = array<i32: 2, 1>} : memref<60x16xf32, #tpu.memory_space<vmem>>, vector<7x16xf32>
    %c31 = arith.constant 31 : index
    %c0_75 = arith.constant 0 : index
    %74 = tpu.strided_load %arg10[%c31, %c0_75] {strides = array<i32: 2, 1>} : memref<60x16xf32, #tpu.memory_space<vmem>>, vector<7x16xf32>
    %c32_76 = arith.constant 32 : index
    %c0_77 = arith.constant 0 : index
    %75 = tpu.strided_load %arg10[%c32_76, %c0_77] {strides = array<i32: 2, 1>} : memref<60x16xf32, #tpu.memory_space<vmem>>, vector<7x16xf32>
    %cst_78 = arith.constant 1.000000e+00 : f32
    %76 = vector.broadcast %cst_78 : f32 to vector<7x1xf32>
    %77 = tpu.concatenate %73, %74, %75, %76 in 1 : vector<7x16xf32>, vector<7x16xf32>, vector<7x16xf32>, vector<7x1xf32> -> vector<7x49xf32>
    %c0_79 = arith.constant 0 : index
    %c0_80 = arith.constant 0 : index
    %78 = vector.load %arg4[%c0_79, %c0_80] : memref<49x16xf32, #tpu.memory_space<vmem>>, vector<49x16xf32>
    %cst_81 = arith.constant dense<0.000000e+00> : vector<7x16xf32>
    %79 = tpu.matmul %77, %78, %cst_81 {dimension_numbers = #tpu.dot_dimension_numbers<[1], [0], [0], [1], [0, 0, 1, 1], [], []>} : vector<7x49xf32>, vector<49x16xf32>, vector<7x16xf32> -> vector<7x16xf32>
    %80 = math.tanh %79 : vector<7x16xf32>
    %c14 = arith.constant 14 : index
    %c0_82 = arith.constant 0 : index
    %81 = vector.load %arg11[%c14, %c0_82] : memref<28x16xf32, #tpu.memory_space<vmem>>, vector<7x16xf32>
    tpu.vector_store %arg11[%c14, %c0_82], %80 {strides = array<i32>} : memref<28x16xf32, #tpu.memory_space<vmem>>, vector<7x16xf32>,
    %c14_83 = arith.constant 14 : index
    %c0_84 = arith.constant 0 : index
    %82 = tpu.strided_load %arg11[%c14_83, %c0_84] {strides = array<i32: 2, 1>} : memref<28x16xf32, #tpu.memory_space<vmem>>, vector<3x16xf32>
    %c15_85 = arith.constant 15 : index
    %c0_86 = arith.constant 0 : index
    %83 = tpu.strided_load %arg11[%c15_85, %c0_86] {strides = array<i32: 2, 1>} : memref<28x16xf32, #tpu.memory_space<vmem>>, vector<3x16xf32>
    %c16_87 = arith.constant 16 : index
    %c0_88 = arith.constant 0 : index
    %84 = tpu.strided_load %arg11[%c16_87, %c0_88] {strides = array<i32: 2, 1>} : memref<28x16xf32, #tpu.memory_space<vmem>>, vector<3x16xf32>
    %cst_89 = arith.constant 1.000000e+00 : f32
    %85 = vector.broadcast %cst_89 : f32 to vector<3x1xf32>
    %86 = tpu.concatenate %82, %83, %84, %85 in 1 : vector<3x16xf32>, vector<3x16xf32>, vector<3x16xf32>, vector<3x1xf32> -> vector<3x49xf32>
    %c0_90 = arith.constant 0 : index
    %c0_91 = arith.constant 0 : index
    %87 = vector.load %arg5[%c0_90, %c0_91] : memref<49x16xf32, #tpu.memory_space<vmem>>, vector<49x16xf32>
    %cst_92 = arith.constant dense<0.000000e+00> : vector<3x16xf32>
    %88 = tpu.matmul %86, %87, %cst_92 {dimension_numbers = #tpu.dot_dimension_numbers<[1], [0], [0], [1], [0, 0, 1, 1], [], []>} : vector<3x49xf32>, vector<49x16xf32>, vector<3x16xf32> -> vector<3x16xf32>
    %cst_93 = arith.constant dense<0xFF800000> : vector<16xf32>
    %89 = vector.multi_reduction <maximumf>, %88, %cst_93 [0] : vector<3x16xf32> to vector<16xf32>
    %90 = vector.shape_cast %89 : vector<16xf32> to vector<1x16xf32>
    %c96 = arith.constant 96 : index
    %c0_94 = arith.constant 0 : index
    %91 = tpu.strided_load %arg9[%c96, %c0_94] {strides = array<i32: 2, 1>} : memref<128x32xf32, #tpu.memory_space<vmem>>, vector<15x32xf32>
    %c97 = arith.constant 97 : index
    %c0_95 = arith.constant 0 : index
    %92 = tpu.strided_load %arg9[%c97, %c0_95] {strides = array<i32: 2, 1>} : memref<128x32xf32, #tpu.memory_space<vmem>>, vector<15x32xf32>
    %c98 = arith.constant 98 : index
    %c0_96 = arith.constant 0 : index
    %93 = tpu.strided_load %arg9[%c98, %c0_96] {strides = array<i32: 2, 1>} : memref<128x32xf32, #tpu.memory_space<vmem>>, vector<15x32xf32>
    %cst_97 = arith.constant 1.000000e+00 : f32
    %94 = vector.broadcast %cst_97 : f32 to vector<15x1xf32>
    %95 = tpu.concatenate %91, %92, %93, %94 in 1 : vector<15x32xf32>, vector<15x32xf32>, vector<15x32xf32>, vector<15x1xf32> -> vector<15x97xf32>
    %c0_98 = arith.constant 0 : index
    %c0_99 = arith.constant 0 : index
    %96 = vector.load %arg3[%c0_98, %c0_99] : memref<97x16xf32, #tpu.memory_space<vmem>>, vector<97x16xf32>
    %cst_100 = arith.constant dense<0.000000e+00> : vector<15x16xf32>
    %97 = tpu.matmul %95, %96, %cst_100 {dimension_numbers = #tpu.dot_dimension_numbers<[1], [0], [0], [1], [0, 0, 1, 1], [], []>} : vector<15x97xf32>, vector<97x16xf32>, vector<15x16xf32> -> vector<15x16xf32>
    %98 = math.tanh %97 : vector<15x16xf32>
    %c45 = arith.constant 45 : index
    %c0_101 = arith.constant 0 : index
    %99 = vector.load %arg10[%c45, %c0_101] : memref<60x16xf32, #tpu.memory_space<vmem>>, vector<15x16xf32>
    tpu.vector_store %arg10[%c45, %c0_101], %98 {strides = array<i32>} : memref<60x16xf32, #tpu.memory_space<vmem>>, vector<15x16xf32>,
    %c45_102 = arith.constant 45 : index
    %c0_103 = arith.constant 0 : index
    %100 = tpu.strided_load %arg10[%c45_102, %c0_103] {strides = array<i32: 2, 1>} : memref<60x16xf32, #tpu.memory_space<vmem>>, vector<7x16xf32>
    %c46 = arith.constant 46 : index
    %c0_104 = arith.constant 0 : index
    %101 = tpu.strided_load %arg10[%c46, %c0_104] {strides = array<i32: 2, 1>} : memref<60x16xf32, #tpu.memory_space<vmem>>, vector<7x16xf32>
    %c47 = arith.constant 47 : index
    %c0_105 = arith.constant 0 : index
    %102 = tpu.strided_load %arg10[%c47, %c0_105] {strides = array<i32: 2, 1>} : memref<60x16xf32, #tpu.memory_space<vmem>>, vector<7x16xf32>
    %cst_106 = arith.constant 1.000000e+00 : f32
    %103 = vector.broadcast %cst_106 : f32 to vector<7x1xf32>
    %104 = tpu.concatenate %100, %101, %102, %103 in 1 : vector<7x16xf32>, vector<7x16xf32>, vector<7x16xf32>, vector<7x1xf32> -> vector<7x49xf32>
    %c0_107 = arith.constant 0 : index
    %c0_108 = arith.constant 0 : index
    %105 = vector.load %arg4[%c0_107, %c0_108] : memref<49x16xf32, #tpu.memory_space<vmem>>, vector<49x16xf32>
    %cst_109 = arith.constant dense<0.000000e+00> : vector<7x16xf32>
    %106 = tpu.matmul %104, %105, %cst_109 {dimension_numbers = #tpu.dot_dimension_numbers<[1], [0], [0], [1], [0, 0, 1, 1], [], []>} : vector<7x49xf32>, vector<49x16xf32>, vector<7x16xf32> -> vector<7x16xf32>
    %107 = math.tanh %106 : vector<7x16xf32>
    %c21 = arith.constant 21 : index
    %c0_110 = arith.constant 0 : index
    %108 = vector.load %arg11[%c21, %c0_110] : memref<28x16xf32, #tpu.memory_space<vmem>>, vector<7x16xf32>
    tpu.vector_store %arg11[%c21, %c0_110], %107 {strides = array<i32>} : memref<28x16xf32, #tpu.memory_space<vmem>>, vector<7x16xf32>,
    %c21_111 = arith.constant 21 : index
    %c0_112 = arith.constant 0 : index
    %109 = tpu.strided_load %arg11[%c21_111, %c0_112] {strides = array<i32: 2, 1>} : memref<28x16xf32, #tpu.memory_space<vmem>>, vector<3x16xf32>
    %c22 = arith.constant 22 : index
    %c0_113 = arith.constant 0 : index
    %110 = tpu.strided_load %arg11[%c22, %c0_113] {strides = array<i32: 2, 1>} : memref<28x16xf32, #tpu.memory_space<vmem>>, vector<3x16xf32>
    %c23 = arith.constant 23 : index
    %c0_114 = arith.constant 0 : index
    %111 = tpu.strided_load %arg11[%c23, %c0_114] {strides = array<i32: 2, 1>} : memref<28x16xf32, #tpu.memory_space<vmem>>, vector<3x16xf32>
    %cst_115 = arith.constant 1.000000e+00 : f32
    %112 = vector.broadcast %cst_115 : f32 to vector<3x1xf32>
    %113 = tpu.concatenate %109, %110, %111, %112 in 1 : vector<3x16xf32>, vector<3x16xf32>, vector<3x16xf32>, vector<3x1xf32> -> vector<3x49xf32>
    %c0_116 = arith.constant 0 : index
    %c0_117 = arith.constant 0 : index
    %114 = vector.load %arg5[%c0_116, %c0_117] : memref<49x16xf32, #tpu.memory_space<vmem>>, vector<49x16xf32>
    %cst_118 = arith.constant dense<0.000000e+00> : vector<3x16xf32>
    %115 = tpu.matmul %113, %114, %cst_118 {dimension_numbers = #tpu.dot_dimension_numbers<[1], [0], [0], [1], [0, 0, 1, 1], [], []>} : vector<3x49xf32>, vector<49x16xf32>, vector<3x16xf32> -> vector<3x16xf32>
    %cst_119 = arith.constant dense<0xFF800000> : vector<16xf32>
    %116 = vector.multi_reduction <maximumf>, %115, %cst_119 [0] : vector<3x16xf32> to vector<16xf32>
    %117 = vector.shape_cast %116 : vector<16xf32> to vector<1x16xf32>
    %118 = tpu.concatenate %36, %63, %90, %117 in 0 : vector<1x16xf32>, vector<1x16xf32>, vector<1x16xf32>, vector<1x16xf32> -> vector<4x16xf32>
    %c0_120 = arith.constant 0 : index
    %c0_121 = arith.constant 0 : index
    %c0_122 = arith.constant 0 : index
    %119 = vector.load %arg7[%c0_120, %c0_121, %c0_122] : memref<1x4x16xf32, #tpu.memory_space<vmem>>, vector<1x4x16xf32>
    %120 = vector.shape_cast %119 : vector<1x4x16xf32> to vector<4x16xf32>
    %121 = arith.mulf %118, %120 : vector<4x16xf32>
    %cst_123 = arith.constant 1.000000e+00 : f32
    %122 = vector.broadcast %cst_123 : f32 to vector<4x1xf32>
    %123 = tpu.concatenate %121, %122 in 1 : vector<4x16xf32>, vector<4x1xf32> -> vector<4x17xf32>
    %c0_124 = arith.constant 0 : index
    %c0_125 = arith.constant 0 : index
    %124 = vector.load %arg6[%c0_124, %c0_125] : memref<17x32xf32, #tpu.memory_space<vmem>>, vector<17x32xf32>
    %cst_126 = arith.constant dense<0.000000e+00> : vector<4x32xf32>
    %125 = tpu.matmul %123, %124, %cst_126 {dimension_numbers = #tpu.dot_dimension_numbers<[1], [0], [0], [1], [0, 0, 1, 1], [], []>} : vector<4x17xf32>, vector<17x32xf32>, vector<4x32xf32> -> vector<4x32xf32>
    %c0_127 = arith.constant 0 : index
    %c0_128 = arith.constant 0 : index
    %c0_129 = arith.constant 0 : index
    %126 = vector.load %arg8[%c0_127, %c0_128, %c0_129] : memref<1x4x32xf32, #tpu.memory_space<vmem>>, vector<1x4x32xf32>
    %127 = vector.shape_cast %126 : vector<1x4x32xf32> to vector<4x32xf32>
    %128 = vector.shape_cast %125 : vector<4x32xf32> to vector<1x4x32xf32>
    tpu.vector_store %arg8[%c0_127, %c0_128, %c0_129], %128 {strides = array<i32>} : memref<1x4x32xf32, #tpu.memory_space<vmem>>, vector<1x4x32xf32>,
    return
  }
  func.func @transform_0(%arg0: i32) -> (i32, i32, i32) {
    %c0_i32 = arith.constant 0 : i32
    %c0_i32_0 = arith.constant 0 : i32
    %c0_i32_1 = arith.constant 0 : i32
    return %arg0, %c0_i32, %c0_i32_0 : i32, i32, i32
  }
  func.func @transform_1(%arg0: i32) -> (i32, i32) {
    %c0_i32 = arith.constant 0 : i32
    %c0_i32_0 = arith.constant 0 : i32
    %c0_i32_1 = arith.constant 0 : i32
    return %c0_i32, %c0_i32_0 : i32, i32
  }
  func.func @transform_2(%arg0: i32) -> (i32, i32) {
    %c0_i32 = arith.constant 0 : i32
    %c0_i32_0 = arith.constant 0 : i32
    %c0_i32_1 = arith.constant 0 : i32
    return %c0_i32, %c0_i32_0 : i32, i32
  }
  func.func @transform_3(%arg0: i32) -> (i32, i32) {
    %c0_i32 = arith.constant 0 : i32
    %c0_i32_0 = arith.constant 0 : i32
    %c0_i32_1 = arith.constant 0 : i32
    return %c0_i32, %c0_i32_0 : i32, i32
  }
  func.func @transform_4(%arg0: i32) -> (i32, i32) {
    %c0_i32 = arith.constant 0 : i32
    %c0_i32_0 = arith.constant 0 : i32
    %c0_i32_1 = arith.constant 0 : i32
    return %c0_i32, %c0_i32_0 : i32, i32
  }
  func.func @transform_5(%arg0: i32) -> (i32, i32) {
    %c0_i32 = arith.constant 0 : i32
    %c0_i32_0 = arith.constant 0 : i32
    %c0_i32_1 = arith.constant 0 : i32
    return %c0_i32, %c0_i32_0 : i32, i32
  }
  func.func @transform_6(%arg0: i32) -> (i32, i32, i32) {
    %c0_i32 = arith.constant 0 : i32
    %c0_i32_0 = arith.constant 0 : i32
    %c0_i32_1 = arith.constant 0 : i32
    return %arg0, %c0_i32, %c0_i32_0 : i32, i32, i32
  }
  func.func @transform_7(%arg0: i32) -> (i32, i32, i32) {
    %c0_i32 = arith.constant 0 : i32
    %c0_i32_0 = arith.constant 0 : i32
    %c0_i32_1 = arith.constant 0 : i32
    return %arg0, %c0_i32, %c0_i32_0 : i32, i32, i32
  }
}

</mosaic_0001>

<bundles_post_ra>
// kernel: tpu_custom_call.1
= control target key start
LH: loop header
LB: loop body
LE: loop exit
PB: predicated region body
PF: predicated region fallthrough
CT: control target
= control target key end

     0   :  { %v2602_v2 = vmov 0   ;;  %s3205_s0 = inlined_call_operand.vmem [shape: s32[1,128,1], index: 0, kind: input, shape index: {}]   ;;  %s3206_s1 = inlined_call_operand.vmem [shape: f32[50,32], index: 1, kind: input, shape index: {}]   ;;  %s3207_s2 = inlined_call_operand.vmem [shape: f32[97,16], index: 2, kind: input, shape index: {}]   ;;  %s3208_s3 = inlined_call_operand.vmem [shape: f32[49,16], index: 3, kind: input, shape index: {}]   ;;  %s3209_s4 = inlined_call_operand.vmem [shape: f32[49,16], index: 4, kind: input, shape index: {}]   ;;  %s3210_s5 = inlined_call_operand.vmem [shape: f32[17,32], index: 5, kind: input, shape index: {}]   ;;  %s3211_s6 = inlined_call_operand.vmem [shape: f32[1,4,16], index: 6, kind: input, shape index: {}]   ;;  %s3212_s7 = inlined_call_operand.hbm [shape: f32[1,4,32], index: 7, kind: output, shape index: {}]  }
   0x1   :  { %v29_v0 = vld [vmem:[%s3205_s0 + $0x10] sm:$0xff]  ;;  %v27_v1 = vld [vmem:[%s3205_s0] sm:$0xff]  ;;  %2553 = vset.pattern.permute.xlu1 %v2602_v2  ;;  %2552 = vset.pattern.permute.xlu0 %v2602_v2  ;;  %v30_v3 = vld [vmem:[%s3205_s0 + $0x18] sm:$0xff] }
   0x2   :  { %v141_v4 = vld [vmem:[%s3206_s1] sm:$0xff]  ;;  %v142_v5 = vld [vmem:[%s3206_s1 + $0x8] sm:$0xff]  ;;  %52 = vperm.xlu1 %2553, %v29_v0   ;;  %46 = vperm.xlu0 %2552, %v27_v1   ;;  %v143_v8 = vld [vmem:[%s3206_s1 + $0x10] sm:$0xff] }
   0x3   :  { %v28_v6 = vld [vmem:[%s3205_s0 + $0x8] sm:$0xff]  ;;  %v2361_v7 = vpack.c.bf16 %v142_v5, %v141_v4  ;;  %v144_v9 = vld [vmem:[%s3206_s1 + $0x18] sm:$0xff]  ;;  %v145_v11 = vld [vmem:[%s3206_s1 + $0x20] sm:$0xff] }
   0x4   :  { %v2365_v10 = vpack.c.bf16 %v144_v9, %v143_v8  ;;  %v146_v12 = vld [vmem:[%s3206_s1 + $0x28] sm:$0xff] }
   0x5   :  { %12 = vsyncpa [#allocation6], 0  ;;  %2362 = vmatprep.subr.bf16.mxu0 %v2361_v7  ;;  %v2369_v13 = vpack.c.bf16 %v146_v12, %v145_v11  ;;  %v147_v14 = vld [vmem:[%s3206_s1 + $0x30] sm:$0x3]  ;;  %vm197_vm0 = vcmask 1041408   ;;  %v43_v15 = vlaneseq  ;;  %vm148_vm1 = vcmask 408576  }
   0x6   :  { %2364 = vmatpush3.bf16.msra.mxu0 %v2361_v7  ;;  %55 = vperm.xlu1 %2553, %v30_v3   ;;  %v2603_v19 = vmov 0.0   ;;  %v398_v26 = vld [vmem:[%s3207_s2] sm:$0xff]  ;;  %v399_v27 = vld [vmem:[%s3207_s2 + $0x8] sm:$0xff]  ;;  %v400_v28 = vld [vmem:[%s3207_s2 + $0x10] sm:$0xff]  ;;  %vm346_vm6 = vcmask 261120   ;;  %vm418_vm7 = vcmask 1040384  }
   0x7   :  { %49 = vperm.xlu0 %2552, %v28_v6   ;;  %2366 = vmatprep.subr.bf16.mxu0 %v2365_v10  ;;  %v2685_v16 = vand.u32 127, %v43_v15  ;;  %v2708_v29 = vpack.c.bf16 %v399_v27, %v398_v26  ;;  %v401_v30 = vld [vmem:[%s3207_s2 + $0x18] sm:$0xff]  ;;  %v402_v32 = vld [vmem:[%s3207_s2 + $0x20] sm:$0xff]  ;;  %v403_v33 = vld [vmem:[%s3207_s2 + $0x28] sm:$0xff]  ;;  %s2604_s24 = smov 32   ;;  %s2605_s25 = smov 64  }
   0x8   :  { %v2713_v31 = vpack.c.bf16 %v401_v30, %v400_v28  ;;  %v2724_v34 = vpack.c.bf16 %v403_v33, %v402_v32  ;;  %v404_v35 = vld [vmem:[%s3207_s2 + $0x30] sm:$0xff]  ;;  %v405_v36 = vld [vmem:[%s3207_s2 + $0x38] sm:$0xff]  ;;  %v406_v38 = vld [vmem:[%s3207_s2 + $0x40] sm:$0xff]  ;;  %vm392_vm8 = vcmask 523264   ;;  %vm395_vm9 = vcmask 785408   ;;  %s2608_s26 = smov 16  }
   0x9   :  { %2374 = vmatprep.subr.bf16.mxu1 %v2708_v29  ;;  %v2734_v37 = vpack.c.bf16 %v405_v36, %v404_v35  ;;  %v407_v39 = vld [vmem:[%s3207_s2 + $0x48] sm:$0xff]  ;;  %v408_v41 = vld [vmem:[%s3207_s2 + $0x50] sm:$0xff]  ;;  %v409_v42 = vld [vmem:[%s3207_s2 + $0x58] sm:$0xff]  ;;  %vm411_vm10 = vcmask 793600   ;;  %vm501_vm15 = vcmask 129024  }
   0xa   :  { %2368 = vmatpush3.bf16.msra.mxu0 %v2365_v10  ;;  %2376 = vmatpush3.bf16.msra.mxu1 %v2708_v29  ;;  %v2745_v40 = vpack.c.bf16 %v407_v39, %v406_v38  ;;  %v2755_v44 = vpack.c.bf16 %v409_v42, %v408_v41  ;;  %v410_v48 = vld [vmem:[%s3207_s2 + $0x60] sm:$0x1]  ;;  %v33_v54 = vld [vmem:[%s3205_s0 + $0x30] sm:$0xff]  ;;  %v32_v55 = vld [vmem:[%s3205_s0 + $0x28] sm:$0xff] }
   0xb   :  { %2370 = vmatprep.subr.bf16.mxu0 %v2369_v13  ;;  %2378 = vmatprep.subr.bf16.mxu1 %v2713_v31  ;;  %v31_v52 = vld [vmem:[%s3205_s0 + $0x20] sm:$0xff]  ;;  %v34_v56 = vld [vmem:[%s3205_s0 + $0x38] sm:$0xff]  ;;  %v522_v15 = vld [vmem:[%s3208_s3 + $0x10] sm:$0xff] }
   0xc   :  { %v526_v27 = vld [vmem:[%s3208_s3 + $0x30] sm:$0x1] }
   0xe   :  { %2372 = vmatpush3.bf16.msra.mxu0 %v2369_v13  ;;  %2380 = vmatpush3.bf16.msra.mxu1 %v2713_v31  ;;  %v520_v13 = vld [vmem:[%s3208_s3] sm:$0xff] }
   0xf   :  { %2074 = vmatprep.subr.msk.mxu0 %vm197_vm0, %v147_v14  ;;  %2382 = vmatprep.subr.bf16.mxu1 %v2724_v34 }
  0x12   :  { %2075 = vmatpush3.msk.msra.mxu0 %vm197_vm0, %v147_v14  ;;  %2384 = vmatpush3.bf16.msra.mxu1 %v2724_v34  ;;  %v521_v14 = vld [vmem:[%s3208_s3 + $0x8] sm:$0xff] }
  0x13   :  { %2386 = vmatprep.subr.bf16.mxu1 %v2734_v37 }
  0x16   :  { %2388 = vmatpush3.bf16.msra.mxu1 %v2734_v37 }
  0x17   :  { %2390 = vmatprep.subr.bf16.mxu1 %v2745_v40 }
  0x1a   :  { %2392 = vmatpush3.bf16.msra.mxu1 %v2745_v40 }
  0x1b   :  { %2394 = vmatprep.subr.bf16.mxu1 %v2755_v44 }
  0x1e   :  { %2396 = vmatpush3.bf16.msra.mxu1 %v2755_v44 }
  0x1f   :  { %2124 = vmatprep.subr.msk.mxu1 %vm418_vm7, %v410_v48 }
  0x22   :  { %2125 = vmatpush3.msk.msra.mxu1 %vm418_vm7, %v410_v48  ;;  %v37_v48 = vld [vmem:[%s3205_s0 + $0x50] sm:$0xff] }
  0x81   :  { %v53_v17 = vpop.permute.xlu1 %52  ;;  %v47_v18 = vpop.permute.xlu0 %46 }
  0x82   :  { %vm93_vm2 = vcmp.eq.s32.totalorder %v2685_v16, %v47_v18  ;;  %vm95_vm3 = vcmp.eq.s32.totalorder %v2685_v16, %v53_v17  ;;  %v2606_v17 = vmov 0.0|0.0   ;;  %v2814_v18 = vpack.c.bf16 %v521_v14, %v520_v13 }
  0x83   :  { %v1848_v20 = vsel %vm93_vm2, 1.0, %v2603_v19  ;;  %v1850_v23 = vsel %vm95_vm3, 1.0, %v2603_v19  ;;  %2397 = vmatprep.subr.bf16.mxu1 %v2606_v17  ;;  %2406 = vmatprep.subr.bf16.mxu0 %v2606_v17  ;;  %vm499_vm2 = vcmask 130048   ;;  %vm2607_vm3 = vmmov 0  }
  0x84   :  { %2076 = vmatprep.mubr.msk.f32.mxu0 %vm148_vm1, %v1848_v20  ;;  %v523_v20 = vld [vmem:[%s3208_s3 + $0x18] sm:$0xff] }
  0x85   :  { %v56_v21 = vpop.permute.xlu1 %55 }
  0x86   :  { %v50_v22 = vpop.permute.xlu0 %49  ;;  %vm96_vm5 = vcmp.eq.s32.totalorder %v2685_v16, %v56_v21  ;;  %v2821_v21 = vpack.c.bf16 %v523_v20, %v522_v15 }
  0x87   :  { %vm94_vm4 = vcmp.eq.s32.totalorder %v2685_v16, %v50_v22  ;;  %v1851_v25 = vsel %vm96_vm5, 1.0, %v2603_v19  ;;  %v524_v22 = vld [vmem:[%s3208_s3 + $0x20] sm:$0xff]  ;;  %vm527_vm5 = vcmask 400384  }
  0x88   :  { %v1849_v24 = vsel %vm94_vm4, 1.0, %v2603_v19  ;;  %vm518_vm4 = vcmask 392192  }
  0x89   :  { %2077 = vmatmul.mubr.msk.f32.vlgmr.msra.gmra.mrb[0].mxu0 %vm148_vm1, %v1849_v24 }
  0x8a   :  { %2079 = vmatprep.mubr.msk.f32.mxu0 %vm148_vm1, %v1850_v23  ;;  %v525_v23 = vld [vmem:[%s3208_s3 + $0x28] sm:$0xff] }
  0x8b   :  { %v2831_v24 = vpack.c.bf16 %v525_v23, %v524_v22 }
  0x8d   :  { %2080 = vmatmul.mubr.msk.f32.gmra.mrb[2].mxu0 %vm148_vm1, %v1851_v25 }
 0x15c   :  { %v2078_v43 = vpop.f32.mrb[0].mxu0 }
 0x15d   :  { %348 = vst.msk [vmem:[#allocation2 + $0x8] sm:$0xff] %vm346_vm6, %v2078_v43  ;;  %v267_v45 = vpop.f32.mrb[1].mxu0 }
 0x15e   :  { %347 = vst.msk [vmem:[#allocation2] sm:$0xff] %vm346_vm6, %v267_v45  ;;  %v35_v45 = vld [vmem:[%s3205_s0 + $0x40] sm:$0xff] }
 0x160   :  { %v2081_v46 = vpop.f32.mrb[2].mxu0 }
 0x161   :  { %350 = vst.msk [vmem:[#allocation2 + $0x18] sm:$0xff] %vm346_vm6, %v2081_v46  ;;  %v277_v47 = vpop.f32.mrb[3].mxu0 }
 0x162   :  { %349 = vst.msk [vmem:[#allocation2 + $0x10] sm:$0xff] %vm346_vm6, %v277_v47  ;;  %v36_v47 = vld [vmem:[%s3205_s0 + $0x48] sm:$0xff] }
 0x165   :  { %v367_v49 = vld [vmem:[#allocation2 + $0x1] ss:$2 sm:$0xff]  ;;  %v363_v58 = vld [vmem:[#allocation2] ss:$2 sm:$0xff] }
 0x166   :  { %376 = vrot.lane.b32.xlu0 %v367_v49, %s2604_s24  ;;  %v38_v49 = vld [vmem:[%s3205_s0 + $0x58] sm:$0xff] }
 0x169   :  { %v371_v50 = vld [vmem:[#allocation2 + $0x2] ss:$2 sm:$0xff]  ;;  %v369_v51 = vld [vmem:[#allocation2 + $0x11] ss:$2 sm:$0x7f] }
 0x16a   :  { %384 = vrot.lane.b32.xlu0 %v371_v50, %s2605_s25  ;;  %378 = vrot.lane.b32.xlu1 %v369_v51, %s2604_s24  ;;  %v373_v53 = vld [vmem:[#allocation2 + $0x12] ss:$2 sm:$0x7f]  ;;  %v39_v50 = vld [vmem:[%s3205_s0 + $0x60] sm:$0xff]  ;;  %v40_v51 = vld [vmem:[%s3205_s0 + $0x68] sm:$0xff] }
 0x16b   :  { %v365_v0 = vld [vmem:[#allocation2 + $0x10] ss:$2 sm:$0x7f] }
 0x16e   :  { %58 = vperm.xlu0 %2552, %v31_v52   ;;  %386 = vrot.lane.b32.xlu1 %v373_v53, %s2605_s25  ;;  %v41_v52 = vld [vmem:[%s3205_s0 + $0x70] sm:$0xff]  ;;  %v42_v53 = vld [vmem:[%s3205_s0 + $0x78] sm:$0xff] }
 0x172   :  { %64 = vperm.xlu0 %2552, %v33_v54   ;;  %61 = vperm.xlu1 %2553, %v32_v55  }
 0x176   :  { %67 = vperm.xlu1 %2553, %v34_v56  }
 0x1d8   :  { %v377_v57 = vpop.permute.xlu0 %376 }
 0x1d9   :  { %v390_v59 = vsel %vm346_vm6, %v363_v58, %v377_v57 }
 0x1dc   :  { %v385_v60 = vpop.permute.xlu0 %384  ;;  %v379_v61 = vpop.permute.xlu1 %378 }
 0x1dd   :  { %v393_v62 = vsel %vm392_vm8, %v390_v59, %v385_v60  ;;  %v391_v1 = vsel %vm346_vm6, %v365_v0, %v379_v61 }
 0x1de   :  { %v396_v63 = vsel %vm395_vm9, %v393_v62, 1.0 }
 0x1df   :  { %2126 = vmatprep.mubr.msk.f32.mxu1 %vm411_vm10, %v396_v63 }
 0x1e0   :  { %v387_v2 = vpop.permute.xlu1 %386 }
 0x1e1   :  { %v394_v3 = vsel %vm392_vm8, %v391_v1, %v387_v2 }
 0x1e2   :  { %v397_v4 = vsel %vm395_vm9, %v394_v3, 1.0 }
 0x1e3   :  { %2127 = vmatmul.mubr.msk.f32.vlgmr.msra.gmra.mrb[0].mxu1 %vm411_vm10, %v397_v4  ;;  %v759_v4 = vld [vmem:[%s3207_s2 + $0x60] sm:$0x1] }
 0x1e4   :  { %2399 = vmatpush3.bf16.msra.mxu1 %v2814_v18  ;;  %2143 = vmatprep.mubr.msk.f32.mxu1 %vm2607_vm3, %v2603_v19 }
 0x1e5   :  { %2400 = vmatprep.subr.bf16.mxu1 %v2606_v17 }
 0x1e8   :  { %2402 = vmatpush3.bf16.msra.mxu1 %v2821_v21 }
 0x1e9   :  { %2403 = vmatprep.subr.bf16.mxu1 %v2606_v17 }
 0x1ec   :  { %2405 = vmatpush3.bf16.msra.mxu1 %v2831_v24 }
 0x1ed   :  { %v59_v5 = vpop.permute.xlu0 %58  ;;  %2141 = vmatprep.subr.mxu1 %v2603_v19 }
 0x1ee   :  { %vm97_vm11 = vcmp.eq.s32.totalorder %v2685_v16, %v59_v5 }
 0x1ef   :  { %v1852_v6 = vsel %vm97_vm11, 1.0, %v2603_v19 }
 0x1f0   :  { %2082 = vmatprep.mubr.msk.f32.mxu0 %vm148_vm1, %v1852_v6  ;;  %2142 = vmatpush3.msk.msra.mxu1 %vm418_vm7, %v526_v27 }
 0x1f1   :  { %v65_v7 = vpop.permute.xlu0 %64  ;;  %v62_v8 = vpop.permute.xlu1 %61  ;;  %2416 = vmatprep.subr.bf16.mxu1 %v2708_v29 }
 0x1f2   :  { %vm99_vm12 = vcmp.eq.s32.totalorder %v2685_v16, %v65_v7  ;;  %vm98_vm13 = vcmp.eq.s32.totalorder %v2685_v16, %v62_v8 }
 0x1f3   :  { %v1854_v9 = vsel %vm99_vm12, 1.0, %v2603_v19  ;;  %v1853_v10 = vsel %vm98_vm13, 1.0, %v2603_v19 }
 0x1f4   :  { %2083 = vmatmul.mubr.msk.f32.gmra.mrb[4].mxu0 %vm148_vm1, %v1853_v10 }
 0x1f5   :  { %2085 = vmatprep.mubr.msk.f32.mxu0 %vm148_vm1, %v1854_v9  ;;  %v68_v11 = vpop.permute.xlu1 %67 }
 0x1f6   :  { %vm100_vm14 = vcmp.eq.s32.totalorder %v2685_v16, %v68_v11 }
 0x1f7   :  { %v1855_v12 = vsel %vm100_vm14, 1.0, %v2603_v19 }
 0x1f8   :  { %2086 = vmatmul.mubr.msk.f32.gmra.mrb[6].mxu0 %vm148_vm1, %v1855_v12 }
 0x2b6   :  { %v2128_v25 = vpop.f32.mrb[0].mxu1 }
 0x2b7   :  { %2554 = vtanh.f32 %v2128_v25  ;;  %v488_v26 = vpop.f32.mrb[1].mxu1 }
 0x2b8   :  { %2556 = vtanh.f32 %v488_v26 }
 0x2c1   :  { %v2555_v28 = vpop.eup %2554 }
 0x2c2   :  { %v2557_v30 = vpop.eup %2556  ;;  %502 = vst.msk [vmem:[#allocation3 + $0x8] sm:$0x7f] %vm501_vm15, %v2555_v28 }
 0x2c3   :  { %500 = vst.msk [vmem:[#allocation3] sm:$0xff] %vm499_vm2, %v2557_v30 }
 0x2c7   :  { %v2084_v32 = vpop.f32.mrb[4].mxu0 }
 0x2c8   :  { %352 = vst.msk [vmem:[#allocation2 + $0x28] sm:$0xff] %vm346_vm6, %v2084_v32  ;;  %v287_v33 = vpop.f32.mrb[5].mxu0 }
 0x2c9   :  { %351 = vst.msk [vmem:[#allocation2 + $0x20] sm:$0xff] %vm346_vm6, %v287_v33  ;;  %v623_v33 = vld [vmem:[%s3209_s4 + $0x8] sm:$0xff] }
 0x2ca   :  { %v507_v35 = vld [vmem:[#allocation3 + $0x2] ss:$2 sm:$0x7f]  ;;  %v505_v36 = vld [vmem:[#allocation3 + $0x1] ss:$2 sm:$0x7f] }
 0x2cb   :  { %v2087_v38 = vpop.f32.mrb[6].mxu0  ;;  %513 = vrot.lane.b32.xlu1 %v507_v35, %s2604_s24  ;;  %509 = vrot.lane.b32.xlu0 %v505_v36, %s2608_s26  ;;  %v503_v56 = vld [vmem:[#allocation3] ss:$2 sm:$0x7f]  ;;  %v624_v35 = vld [vmem:[%s3209_s4 + $0x10] sm:$0xff] }
 0x2cc   :  { %354 = vst.msk [vmem:[#allocation2 + $0x38] sm:$0xff] %vm346_vm6, %v2087_v38  ;;  %v297_v39 = vpop.f32.mrb[7].mxu0  ;;  %v625_v38 = vld [vmem:[%s3209_s4 + $0x18] sm:$0xff] }
 0x2cd   :  { %353 = vst.msk [vmem:[#allocation2 + $0x30] sm:$0xff] %vm346_vm6, %v297_v39  ;;  %v2960_v39 = vpack.c.bf16 %v625_v38, %v624_v35 }
 0x2d0   :  { %v718_v41 = vld [vmem:[#allocation2 + $0x21] ss:$2 sm:$0xff]  ;;  %v714_v61 = vld [vmem:[#allocation2 + $0x20] ss:$2 sm:$0xff] }
 0x2d1   :  { %727 = vrot.lane.b32.xlu0 %v718_v41, %s2604_s24  ;;  %v626_v41 = vld [vmem:[%s3209_s4 + $0x20] sm:$0xff] }
 0x2d4   :  { %v720_v42 = vld [vmem:[#allocation2 + $0x31] ss:$2 sm:$0x7f]  ;;  %v722_v43 = vld [vmem:[#allocation2 + $0x22] ss:$2 sm:$0xff] }
 0x2d5   :  { %729 = vrot.lane.b32.xlu1 %v720_v42, %s2604_s24  ;;  %735 = vrot.lane.b32.xlu0 %v722_v43, %s2605_s25  ;;  %v724_v46 = vld [vmem:[#allocation2 + $0x32] ss:$2 sm:$0x7f]  ;;  %v627_v42 = vld [vmem:[%s3209_s4 + $0x28] sm:$0xff] }
 0x2d6   :  { %v716_v5 = vld [vmem:[#allocation2 + $0x30] ss:$2 sm:$0x7f]  ;;  %v2970_v43 = vpack.c.bf16 %v627_v42, %v626_v41 }
 0x2d9   :  { %737 = vrot.lane.b32.xlu1 %v724_v46, %s2605_s25  ;;  %70 = vperm.xlu0 %2552, %v35_v45  }
 0x2dd   :  { %73 = vperm.xlu1 %2553, %v36_v47   ;;  %76 = vperm.xlu0 %2552, %v37_v48   ;;  %v628_v47 = vld [vmem:[%s3209_s4 + $0x30] sm:$0x1] }
 0x2e1   :  { %79 = vperm.xlu1 %2553, %v38_v49   ;;  %82 = vperm.xlu0 %2552, %v39_v50  }
 0x2e5   :  { %85 = vperm.xlu1 %2553, %v40_v51   ;;  %88 = vperm.xlu0 %2552, %v41_v52  }
 0x2e9   :  { %91 = vperm.xlu1 %2553, %v42_v53  }
 0x33d   :  { %v514_v54 = vpop.permute.xlu1 %513  ;;  %v510_v55 = vpop.permute.xlu0 %509 }
 0x33e   :  { %v516_v57 = vsel %vm499_vm2, %v503_v56, %v510_v55 }
 0x33f   :  { %v517_v58 = vsel %vm346_vm6, %v516_v57, %v514_v54 }
 0x340   :  { %v519_v59 = vsel %vm518_vm4, %v517_v58, 1.0 }
 0x341   :  { %2144 = vmatmul.mubr.msk.f32.vlgmr.msra.gmra.mrb[2].mxu1 %vm527_vm5, %v519_v59 }
 0x342   :  { %2418 = vmatpush3.bf16.msra.mxu1 %v2708_v29 }
 0x343   :  { %v728_v60 = vpop.permute.xlu0 %727  ;;  %2420 = vmatprep.subr.bf16.mxu1 %v2713_v31 }
 0x344   :  { %v741_v62 = vsel %vm346_vm6, %v714_v61, %v728_v60 }
 0x346   :  { %2422 = vmatpush3.bf16.msra.mxu1 %v2713_v31 }
 0x347   :  { %v736_v63 = vpop.permute.xlu0 %735  ;;  %2424 = vmatprep.subr.bf16.mxu1 %v2724_v34  ;;  %v730_v2 = vpop.permute.xlu1 %729 }
 0x348   :  { %v743_v0 = vsel %vm392_vm8, %v741_v62, %v736_v63  ;;  %v742_v6 = vsel %vm346_vm6, %v716_v5, %v730_v2  ;;  %v1103_v63 = vld [vmem:[%s3207_s2 + $0x60] sm:$0x1] }
 0x349   :  { %v745_v1 = vsel %vm395_vm9, %v743_v0, 1.0 }
 0x34a   :  { %2426 = vmatpush3.bf16.msra.mxu1 %v2724_v34  ;;  %2189 = vmatprep.mubr.msk.f32.mxu1 %vm411_vm10, %v745_v1 }
 0x34b   :  { %2428 = vmatprep.subr.bf16.mxu1 %v2734_v37  ;;  %v738_v3 = vpop.permute.xlu1 %737 }
 0x34c   :  { %v744_v7 = vsel %vm392_vm8, %v742_v6, %v738_v3 }
 0x34d   :  { %v746_v9 = vsel %vm395_vm9, %v744_v7, 1.0 }
 0x34e   :  { %2430 = vmatpush3.bf16.msra.mxu1 %v2734_v37 }
 0x34f   :  { %2432 = vmatprep.subr.bf16.mxu1 %v2745_v40 }
 0x352   :  { %2434 = vmatpush3.bf16.msra.mxu1 %v2745_v40 }
 0x353   :  { %2436 = vmatprep.subr.bf16.mxu1 %v2755_v44 }
 0x356   :  { %2438 = vmatpush3.bf16.msra.mxu1 %v2755_v44 }
 0x357   :  { %2187 = vmatprep.subr.msk.mxu1 %vm418_vm7, %v759_v4 }
 0x358   :  { %v71_v8 = vpop.permute.xlu0 %70 }
 0x359   :  { %vm101_vm11 = vcmp.eq.s32.totalorder %v2685_v16, %v71_v8 }
 0x35a   :  { %v1856_v10 = vsel %vm101_vm11, 1.0, %v2603_v19  ;;  %2188 = vmatpush3.msk.msra.mxu1 %vm418_vm7, %v759_v4 }
 0x35b   :  { %2190 = vmatmul.mubr.msk.f32.vlgmr.msra.gmra.mrb[4].mxu1 %vm411_vm10, %v746_v9  ;;  %2088 = vmatprep.mubr.msk.f32.mxu0 %vm148_vm1, %v1856_v10 }
 0x35c   :  { %v74_v11 = vpop.permute.xlu1 %73  ;;  %v77_v12 = vpop.permute.xlu0 %76  ;;  %2458 = vmatprep.subr.bf16.mxu1 %v2708_v29 }
 0x35d   :  { %vm102_vm12 = vcmp.eq.s32.totalorder %v2685_v16, %v74_v11  ;;  %vm103_vm13 = vcmp.eq.s32.totalorder %v2685_v16, %v77_v12  ;;  %2460 = vmatpush3.bf16.msra.mxu1 %v2708_v29  ;;  %v871_v12 = vld [vmem:[%s3208_s3 + $0x30] sm:$0x1] }
 0x35e   :  { %v1857_v13 = vsel %vm102_vm12, 1.0, %v2603_v19  ;;  %v1858_v14 = vsel %vm103_vm13, 1.0, %v2603_v19  ;;  %2462 = vmatprep.subr.bf16.mxu1 %v2713_v31 }
 0x35f   :  { %2089 = vmatmul.mubr.msk.f32.gmra.mrb[8].mxu0 %vm148_vm1, %v1857_v13 }
 0x360   :  { %v80_v15 = vpop.permute.xlu1 %79  ;;  %2091 = vmatprep.mubr.msk.f32.mxu0 %vm148_vm1, %v1858_v14  ;;  %v83_v20 = vpop.permute.xlu0 %82 }
 0x361   :  { %vm104_vm14 = vcmp.eq.s32.totalorder %v2685_v16, %v80_v15  ;;  %vm105_vm11 = vcmp.eq.s32.totalorder %v2685_v16, %v83_v20  ;;  %2464 = vmatpush3.bf16.msra.mxu1 %v2713_v31 }
 0x362   :  { %v1859_v22 = vsel %vm104_vm14, 1.0, %v2603_v19  ;;  %v1860_v23 = vsel %vm105_vm11, 1.0, %v2603_v19  ;;  %2466 = vmatprep.subr.bf16.mxu1 %v2724_v34 }
 0x363   :  { %2092 = vmatmul.mubr.msk.f32.gmra.mrb[10].mxu0 %vm148_vm1, %v1859_v22 }
 0x364   :  { %v86_v25 = vpop.permute.xlu1 %85  ;;  %2094 = vmatprep.mubr.msk.f32.mxu0 %vm148_vm1, %v1860_v23  ;;  %v89_v26 = vpop.permute.xlu0 %88 }
 0x365   :  { %vm106_vm12 = vcmp.eq.s32.totalorder %v2685_v16, %v86_v25  ;;  %vm107_vm13 = vcmp.eq.s32.totalorder %v2685_v16, %v89_v26  ;;  %2468 = vmatpush3.bf16.msra.mxu1 %v2724_v34 }
 0x366   :  { %v1861_v27 = vsel %vm106_vm12, 1.0, %v2603_v19  ;;  %v1862_v28 = vsel %vm107_vm13, 1.0, %v2603_v19  ;;  %2470 = vmatprep.subr.bf16.mxu1 %v2734_v37 }
 0x367   :  { %2095 = vmatmul.mubr.msk.f32.gmra.mrb[12].mxu0 %vm148_vm1, %v1861_v27 }
 0x368   :  { %v92_v30 = vpop.permute.xlu1 %91  ;;  %2097 = vmatprep.mubr.msk.f32.mxu0 %vm148_vm1, %v1862_v28 }
 0x369   :  { %vm108_vm14 = vcmp.eq.s32.totalorder %v2685_v16, %v92_v30  ;;  %2472 = vmatpush3.bf16.msra.mxu1 %v2734_v37  ;;  %v622_v16 = vld [vmem:[%s3209_s4] sm:$0xff] }
 0x36a   :  { %v1863_v32 = vsel %vm108_vm14, 1.0, %v2603_v19  ;;  %2474 = vmatprep.subr.bf16.mxu1 %v2745_v40  ;;  %v2954_v36 = vpack.c.bf16 %v623_v33, %v622_v16 }
 0x36b   :  { %2098 = vmatmul.mubr.msk.f32.gmra.mrb[14].mxu0 %vm148_vm1, %v1863_v32  ;;  %vm705_vm1 = vcmask 124928  }
 0x36c   :  { %2160 = vmatprep.mubr.msk.f32.mxu0 %vm2607_vm3, %v2603_v19  ;;  %2408 = vmatpush3.bf16.msra.mxu0 %v2954_v36 }
 0x36d   :  { %2476 = vmatpush3.bf16.msra.mxu1 %v2745_v40  ;;  %2409 = vmatprep.subr.bf16.mxu0 %v2606_v17 }
 0x36e   :  { %2478 = vmatprep.subr.bf16.mxu1 %v2755_v44 }
 0x370   :  { %2411 = vmatpush3.bf16.msra.mxu0 %v2960_v39 }
 0x371   :  { %2480 = vmatpush3.bf16.msra.mxu1 %v2755_v44  ;;  %2412 = vmatprep.subr.bf16.mxu0 %v2606_v17 }
 0x372   :  { %2250 = vmatprep.subr.msk.mxu1 %vm418_vm7, %v1103_v63 }
 0x374   :  { %2414 = vmatpush3.bf16.msra.mxu0 %v2970_v43 }
 0x375   :  { %2158 = vmatprep.subr.mxu0 %v2603_v19  ;;  %2251 = vmatpush3.msk.msra.mxu1 %vm418_vm7, %v1103_v63 }
 0x376   :  { %2500 = vmatprep.subr.bf16.mxu1 %v2708_v29 }
 0x378   :  { %2159 = vmatpush3.msk.msra.mxu0 %vm418_vm7, %v628_v47 }
 0x379   :  { %2439 = vmatprep.subr.bf16.mxu0 %v2606_v17 }
 0x414   :  { %v600_v45 = vpop.f32.mrb[2].mxu1 }
 0x415   :  { %2558 = vtanh.f32 %v600_v45  ;;  %v2145_v46 = vpop.f32.mrb[3].mxu1 }
 0x41f   :  { %v2559_v48 = vpop.eup %2558 }
 0x420   :  { %605 = vst.msk [vmem:[#allocation4] sm:$0x7f] %vm501_vm15, %v2559_v48 }
 0x427   :  { %v610_v49 = vld [vmem:[#allocation4 + $0x2] ss:$2 sm:$0x7]  ;;  %v608_v50 = vld [vmem:[#allocation4 + $0x1] ss:$2 sm:$0x7] }
 0x428   :  { %616 = vrot.lane.b32.xlu1 %v610_v49, %s2604_s24  ;;  %612 = vrot.lane.b32.xlu0 %v608_v50, %s2608_s26  ;;  %v606_v8 = vld [vmem:[#allocation4] ss:$2 sm:$0x7] }
 0x42e   :  { %v2191_v51 = vpop.f32.mrb[4].mxu1 }
 0x42f   :  { %2560 = vtanh.f32 %v2191_v51  ;;  %v835_v52 = vpop.f32.mrb[5].mxu1  ;;  %v1447_v51 = vld [vmem:[%s3207_s2 + $0x60] sm:$0x1] }
 0x430   :  { %2562 = vtanh.f32 %v835_v52 }
 0x432   :  { %v2090_v53 = vpop.f32.mrb[8].mxu0 }
 0x433   :  { %356 = vst.msk [vmem:[#allocation2 + $0x48] sm:$0xff] %vm346_vm6, %v2090_v53  ;;  %v307_v54 = vpop.f32.mrb[9].mxu0 }
 0x434   :  { %355 = vst.msk [vmem:[#allocation2 + $0x40] sm:$0xff] %vm346_vm6, %v307_v54 }
 0x436   :  { %v2093_v55 = vpop.f32.mrb[10].mxu0 }
 0x437   :  { %358 = vst.msk [vmem:[#allocation2 + $0x58] sm:$0xff] %vm346_vm6, %v2093_v55  ;;  %v317_v56 = vpop.f32.mrb[11].mxu0 }
 0x438   :  { %357 = vst.msk [vmem:[#allocation2 + $0x50] sm:$0xff] %vm346_vm6, %v317_v56 }
 0x439   :  { %v2561_v57 = vpop.eup %2560 }
 0x43a   :  { %v2563_v58 = vpop.eup %2562  ;;  %847 = vst.msk [vmem:[#allocation3 + $0x17] sm:$0x7f] %vm501_vm15, %v2561_v57  ;;  %v2096_v59 = vpop.f32.mrb[12].mxu0 }
 0x43b   :  { %846 = vst.msk [vmem:[#allocation3 + $0xf] sm:$0xff] %vm499_vm2, %v2563_v58  ;;  %v327_v60 = vpop.f32.mrb[13].mxu0  ;;  %v1062_v3 = vld [vmem:[#allocation2 + $0x41] ss:$2 sm:$0xff]  ;;  %v1058_v28 = vld [vmem:[#allocation2 + $0x40] ss:$2 sm:$0xff] }
 0x43c   :  { %360 = vst.msk [vmem:[#allocation2 + $0x68] sm:$0xff] %vm346_vm6, %v2096_v59  ;;  %359 = vst.msk [vmem:[#allocation2 + $0x60] sm:$0xff] %vm346_vm6, %v327_v60 }
 0x43e   :  { %v2099_v61 = vpop.f32.mrb[14].mxu0 }
 0x43f   :  { %362 = vst.msk [vmem:[#allocation2 + $0x78] sm:$0xff] %vm346_vm6, %v2099_v61  ;;  %v337_v62 = vpop.f32.mrb[15].mxu0  ;;  %v1064_v2 = vld [vmem:[#allocation2 + $0x51] ss:$2 sm:$0x7f] }
 0x440   :  { %361 = vst.msk [vmem:[#allocation2 + $0x70] sm:$0xff] %vm346_vm6, %v337_v62  ;;  %v1068_v4 = vld [vmem:[#allocation2 + $0x52] ss:$2 sm:$0x7f]  ;;  %v1066_v5 = vld [vmem:[#allocation2 + $0x42] ss:$2 sm:$0xff] }
 0x441   :  { %v1060_v27 = vld [vmem:[#allocation2 + $0x50] ss:$2 sm:$0x7f] }
 0x442   :  { %v853_v0 = vld [vmem:[#allocation3 + $0x11] ss:$2 sm:$0x7f]  ;;  %v851_v1 = vld [vmem:[#allocation3 + $0x10] ss:$2 sm:$0x7f] }
 0x443   :  { %859 = vrot.lane.b32.xlu1 %v853_v0, %s2604_s24  ;;  %855 = vrot.lane.b32.xlu0 %v851_v1, %s2608_s26  ;;  %v849_v15 = vld [vmem:[#allocation3 + $0xf] ss:$2 sm:$0x7f] }
 0x444   :  { %v1406_v55 = vld [vmem:[#allocation2 + $0x61] ss:$2 sm:$0xff] }
 0x447   :  { %1073 = vrot.lane.b32.xlu1 %v1064_v2, %s2604_s24  ;;  %1071 = vrot.lane.b32.xlu0 %v1062_v3, %s2604_s24  ;;  %v1408_v54 = vld [vmem:[#allocation2 + $0x71] ss:$2 sm:$0x7f]  ;;  %v1412_v56 = vld [vmem:[#allocation2 + $0x72] ss:$2 sm:$0x7f] }
 0x448   :  { %v1410_v57 = vld [vmem:[#allocation2 + $0x62] ss:$2 sm:$0xff] }
 0x44b   :  { %1081 = vrot.lane.b32.xlu1 %v1068_v4, %s2605_s25  ;;  %1079 = vrot.lane.b32.xlu0 %v1066_v5, %s2605_s25 }
 0x49a   :  { %v617_v6 = vpop.permute.xlu1 %616  ;;  %v613_v7 = vpop.permute.xlu0 %612 }
 0x49b   :  { %v619_v9 = vsel %vm499_vm2, %v606_v8, %v613_v7  ;;  %v1215_v7 = vld [vmem:[%s3208_s3 + $0x30] sm:$0x1] }
 0x49c   :  { %v620_v10 = vsel %vm346_vm6, %v619_v9, %v617_v6  ;;  %v1404_v8 = vld [vmem:[#allocation2 + $0x70] ss:$2 sm:$0x7f]  ;;  %v1402_v9 = vld [vmem:[#allocation2 + $0x60] ss:$2 sm:$0xff] }
 0x49d   :  { %v621_v11 = vsel %vm518_vm4, %v620_v10, 1.0 }
 0x49e   :  { %2161 = vmatmul.mubr.msk.f32.vlgmr.msra.gmra.mrb[16].mxu0 %vm527_vm5, %v621_v11 }
 0x49f   :  { %2441 = vmatpush3.bf16.msra.mxu0 %v2814_v18  ;;  %2206 = vmatprep.mubr.msk.f32.mxu0 %vm2607_vm3, %v2603_v19 }
 0x4a0   :  { %2442 = vmatprep.subr.bf16.mxu0 %v2606_v17 }
 0x4a3   :  { %2444 = vmatpush3.bf16.msra.mxu0 %v2821_v21 }
 0x4a4   :  { %2445 = vmatprep.subr.bf16.mxu0 %v2606_v17 }
 0x4a7   :  { %2447 = vmatpush3.bf16.msra.mxu0 %v2831_v24 }
 0x4a8   :  { %2204 = vmatprep.subr.mxu0 %v2603_v19 }
 0x4ab   :  { %2205 = vmatpush3.msk.msra.mxu0 %vm418_vm7, %v871_v12 }
 0x4ac   :  { %2448 = vmatprep.subr.bf16.mxu0 %v2606_v17 }
 0x4b5   :  { %v860_v13 = vpop.permute.xlu1 %859  ;;  %v856_v14 = vpop.permute.xlu0 %855 }
 0x4b6   :  { %v862_v20 = vsel %vm499_vm2, %v849_v15, %v856_v14 }
 0x4b7   :  { %v863_v22 = vsel %vm346_vm6, %v862_v20, %v860_v13 }
 0x4b8   :  { %v864_v23 = vsel %vm518_vm4, %v863_v22, 1.0 }
 0x4b9   :  { %v1074_v25 = vpop.permute.xlu1 %1073  ;;  %v1072_v26 = vpop.permute.xlu0 %1071  ;;  %2207 = vmatmul.mubr.msk.f32.vlgmr.msra.gmra.mrb[18].mxu0 %vm527_vm5, %v864_v23 }
 0x4ba   :  { %2450 = vmatpush3.bf16.msra.mxu0 %v2954_v36  ;;  %2223 = vmatprep.mubr.msk.f32.mxu0 %vm2607_vm3, %v2603_v19  ;;  %v1086_v30 = vsel %vm346_vm6, %v1060_v27, %v1074_v25  ;;  %v1085_v32 = vsel %vm346_vm6, %v1058_v28, %v1072_v26 }
 0x4bb   :  { %2451 = vmatprep.subr.bf16.mxu0 %v2606_v17 }
 0x4bd   :  { %v1082_v16 = vpop.permute.xlu1 %1081  ;;  %v1080_v33 = vpop.permute.xlu0 %1079 }
 0x4be   :  { %v1088_v35 = vsel %vm392_vm8, %v1086_v30, %v1082_v16  ;;  %v1087_v38 = vsel %vm392_vm8, %v1085_v32, %v1080_v33  ;;  %2453 = vmatpush3.bf16.msra.mxu0 %v2960_v39 }
 0x4bf   :  { %v1090_v41 = vsel %vm395_vm9, %v1088_v35, 1.0  ;;  %v1089_v42 = vsel %vm395_vm9, %v1087_v38, 1.0  ;;  %2454 = vmatprep.subr.bf16.mxu0 %v2606_v17 }
 0x4c0   :  { %2252 = vmatprep.mubr.msk.f32.mxu1 %vm411_vm10, %v1089_v42 }
 0x4c1   :  { %2253 = vmatmul.mubr.msk.f32.vlgmr.msra.gmra.mrb[6].mxu1 %vm411_vm10, %v1090_v41 }
 0x4c2   :  { %2502 = vmatpush3.bf16.msra.mxu1 %v2708_v29  ;;  %2456 = vmatpush3.bf16.msra.mxu0 %v2970_v43 }
 0x4c3   :  { %2504 = vmatprep.subr.bf16.mxu1 %v2713_v31  ;;  %2221 = vmatprep.subr.mxu0 %v2603_v19 }
 0x4c6   :  { %2506 = vmatpush3.bf16.msra.mxu1 %v2713_v31 }
 0x4c7   :  { %2508 = vmatprep.subr.bf16.mxu1 %v2724_v34 }
 0x4ca   :  { %2510 = vmatpush3.bf16.msra.mxu1 %v2724_v34  ;;  %v973_v34 = vld [vmem:[%s3209_s4 + $0x30] sm:$0x1] }
 0x4cb   :  { %2512 = vmatprep.subr.bf16.mxu1 %v2734_v37  ;;  %2222 = vmatpush3.msk.msra.mxu0 %vm418_vm7, %v973_v34 }
 0x4cc   :  { %2481 = vmatprep.subr.bf16.mxu0 %v2606_v17 }
 0x4ce   :  { %2514 = vmatpush3.bf16.msra.mxu1 %v2734_v37 }
 0x4cf   :  { %2516 = vmatprep.subr.bf16.mxu1 %v2745_v40 }
 0x4d2   :  { %2518 = vmatpush3.bf16.msra.mxu1 %v2745_v40 }
 0x4d3   :  { %2520 = vmatprep.subr.bf16.mxu1 %v2755_v44 }
 0x4d6   :  { %2522 = vmatpush3.bf16.msra.mxu1 %v2755_v44 }
 0x4d7   :  { %2313 = vmatprep.subr.msk.mxu1 %vm418_vm7, %v1447_v51 }
 0x4da   :  { %2314 = vmatpush3.msk.msra.mxu1 %vm418_vm7, %v1447_v51 }
 0x4db   :  { %2541 = vmatprep.subr.bf16.mxu1 %v2606_v17 }
 0x571   :  { %v3053_v29 = vpop.f32.mrb[16].mxu0 }
 0x572   :  { %v2162_v45 = vpop.f32.mrb[17].mxu0  ;;  %v706_v25 = vsel %vm705_vm1, %v3053_v29, -inf }
 0x573   :  { %v707_v26 = vrot.slane %v706_v25, 4 }
 0x575   :  { %v708_v27 = vmax.f32 %v706_v25, %v707_v26  ;;  %v1752_v26 = vld [vmem:[%s3210_s5] sm:$0xff] }
 0x577   :  { %v709_v28 = vrot.slane %v708_v27, 2 }
 0x579   :  { %v710_v35 = vmax.f32 %v708_v27, %v709_v28  ;;  %v1753_v27 = vld [vmem:[%s3210_s5 + $0x8] sm:$0xff] }
 0x57a   :  { %v2542_v28 = vpack.c.bf16 %v1753_v27, %v1752_v26 }
 0x57b   :  { %v711_v42 = vrot.slane %v710_v35, 1 }
 0x58c   :  { %v944_v31 = vpop.f32.mrb[18].mxu0 }
 0x58d   :  { %2564 = vtanh.f32 %v944_v31  ;;  %v2208_v46 = vpop.f32.mrb[19].mxu0 }
 0x58e   :  { %v712_v46 = vmax.f32 %v710_v35, %v711_v42 }
 0x594   :  { %v2254_v47 = vpop.f32.mrb[6].mxu1 }
 0x595   :  { %2566 = vtanh.f32 %v2254_v47  ;;  %v1179_v37 = vpop.f32.mrb[7].mxu1 }
 0x596   :  { %2568 = vtanh.f32 %v1179_v37 }
 0x597   :  { %v2565_v40 = vpop.eup %2564 }
 0x598   :  { %949 = vst.msk [vmem:[#allocation4 + $0x7] sm:$0x7f] %vm501_vm15, %v2565_v40 }
 0x59f   :  { %v2567_v44 = vpop.eup %2566  ;;  %v955_v48 = vld [vmem:[#allocation4 + $0x9] ss:$2 sm:$0x7]  ;;  %v953_v49 = vld [vmem:[#allocation4 + $0x8] ss:$2 sm:$0x7] }
 0x5a0   :  { %v2569_v50 = vpop.eup %2568  ;;  %1191 = vst.msk [vmem:[#allocation3 + $0x26] sm:$0x7f] %vm501_vm15, %v2567_v44  ;;  %961 = vrot.lane.b32.xlu1 %v955_v48, %s2604_s24  ;;  %957 = vrot.lane.b32.xlu0 %v953_v49, %s2608_s26  ;;  %v951_v60 = vld [vmem:[#allocation4 + $0x7] ss:$2 sm:$0x7] }
 0x5a1   :  { %1190 = vst.msk [vmem:[#allocation3 + $0x1e] sm:$0xff] %vm499_vm2, %v2569_v50  ;;  %v1317_v48 = vld [vmem:[%s3209_s4 + $0x30] sm:$0x1] }
 0x5a8   :  { %v1197_v52 = vld [vmem:[#allocation3 + $0x20] ss:$2 sm:$0x7f]  ;;  %v1195_v53 = vld [vmem:[#allocation3 + $0x1f] ss:$2 sm:$0x7f] }
 0x5a9   :  { %1203 = vrot.lane.b32.xlu1 %v1197_v52, %s2604_s24  ;;  %1199 = vrot.lane.b32.xlu0 %v1195_v53, %s2608_s26  ;;  %v1193_v2 = vld [vmem:[#allocation3 + $0x1e] ss:$2 sm:$0x7f] }
 0x5ad   :  { %1417 = vrot.lane.b32.xlu1 %v1408_v54, %s2604_s24  ;;  %1415 = vrot.lane.b32.xlu0 %v1406_v55, %s2604_s24 }
 0x5b1   :  { %1425 = vrot.lane.b32.xlu1 %v1412_v56, %s2605_s25  ;;  %1423 = vrot.lane.b32.xlu0 %v1410_v57, %s2605_s25 }
 0x612   :  { %v962_v58 = vpop.permute.xlu1 %961  ;;  %v958_v59 = vpop.permute.xlu0 %957 }
 0x613   :  { %v964_v61 = vsel %vm499_vm2, %v951_v60, %v958_v59 }
 0x614   :  { %v965_v62 = vsel %vm346_vm6, %v964_v61, %v962_v58 }
 0x615   :  { %v966_v63 = vsel %vm518_vm4, %v965_v62, 1.0 }
 0x616   :  { %2224 = vmatmul.mubr.msk.f32.vlgmr.msra.gmra.mrb[20].mxu0 %vm527_vm5, %v966_v63 }
 0x617   :  { %2483 = vmatpush3.bf16.msra.mxu0 %v2814_v18  ;;  %2269 = vmatprep.mubr.msk.f32.mxu0 %vm2607_vm3, %v2603_v19 }
 0x618   :  { %2484 = vmatprep.subr.bf16.mxu0 %v2606_v17 }
 0x61b   :  { %2486 = vmatpush3.bf16.msra.mxu0 %v2821_v21  ;;  %v1204_v0 = vpop.permute.xlu1 %1203  ;;  %v1200_v1 = vpop.permute.xlu0 %1199 }
 0x61c   :  { %2487 = vmatprep.subr.bf16.mxu0 %v2606_v17  ;;  %v1206_v3 = vsel %vm499_vm2, %v1193_v2, %v1200_v1 }
 0x61d   :  { %v1207_v6 = vsel %vm346_vm6, %v1206_v3, %v1204_v0 }
 0x61e   :  { %v1208_v10 = vsel %vm518_vm4, %v1207_v6, 1.0 }
 0x61f   :  { %2489 = vmatpush3.bf16.msra.mxu0 %v2831_v24  ;;  %v1418_v4 = vpop.permute.xlu1 %1417  ;;  %v1416_v5 = vpop.permute.xlu0 %1415 }
 0x620   :  { %2267 = vmatprep.subr.mxu0 %v2603_v19  ;;  %v1430_v11 = vsel %vm346_vm6, %v1404_v8, %v1418_v4  ;;  %v1429_v12 = vsel %vm346_vm6, %v1402_v9, %v1416_v5 }
 0x623   :  { %2268 = vmatpush3.msk.msra.mxu0 %vm418_vm7, %v1215_v7  ;;  %v1426_v13 = vpop.permute.xlu1 %1425  ;;  %v1424_v14 = vpop.permute.xlu0 %1423 }
 0x624   :  { %v1432_v15 = vsel %vm392_vm8, %v1430_v11, %v1426_v13  ;;  %v1431_v20 = vsel %vm392_vm8, %v1429_v12, %v1424_v14  ;;  %2270 = vmatmul.mubr.msk.f32.vlgmr.msra.gmra.mrb[22].mxu0 %vm527_vm5, %v1208_v10  ;;  %2490 = vmatprep.subr.bf16.mxu0 %v2606_v17 }
 0x625   :  { %v1434_v22 = vsel %vm395_vm9, %v1432_v15, 1.0  ;;  %v1433_v23 = vsel %vm395_vm9, %v1431_v20, 1.0  ;;  %2492 = vmatpush3.bf16.msra.mxu0 %v2954_v36  ;;  %2286 = vmatprep.mubr.msk.f32.mxu0 %vm2607_vm3, %v2603_v19 }
 0x626   :  { %2315 = vmatprep.mubr.msk.f32.mxu1 %vm411_vm10, %v1433_v23  ;;  %2493 = vmatprep.subr.bf16.mxu0 %v2606_v17 }
 0x627   :  { %2316 = vmatmul.mubr.msk.f32.vlgmr.msra.gmra.mrb[8].mxu1 %vm411_vm10, %v1434_v22 }
 0x628   :  { %2358 = vmatprep.mubr.msk.f32.mxu1 %vm2607_vm3, %v2603_v19  ;;  %2543 = vmatpush3.bf16.msra.mxu1 %v2542_v28 }
 0x629   :  { %2495 = vmatpush3.bf16.msra.mxu0 %v2960_v39  ;;  %2356 = vmatprep.subr.mxu1 %v2603_v19 }
 0x62a   :  { %2496 = vmatprep.subr.bf16.mxu0 %v2606_v17 }
 0x62d   :  { %2498 = vmatpush3.bf16.msra.mxu0 %v2970_v43 }
 0x62e   :  { %2284 = vmatprep.subr.mxu0 %v2603_v19 }
 0x631   :  { %2285 = vmatpush3.msk.msra.mxu0 %vm418_vm7, %v1317_v48 }
 0x632   :  { %2523 = vmatprep.subr.bf16.mxu0 %v2606_v17 }
 0x6e9   :  { %v1046_v30 = vpop.f32.mrb[20].mxu0 }
 0x6ea   :  { %v1050_v32 = vsel %vm705_vm1, %v1046_v30, -inf  ;;  %v2225_v16 = vpop.f32.mrb[21].mxu0  ;;  %v1754_v30 = vld [vmem:[%s3210_s5 + $0x10] sm:$0x1]  ;;  %s2609_s5 = smov [#allocation5]  }
 0x6eb   :  { %v1051_v33 = vrot.slane %v1050_v32, 4  ;;  %2357 = vmatpush3.msk.msra.mxu1 %vm418_vm7, %v1754_v30  ;;  %s1840_s10 = sshll.u32 %s2609_s5, 4  ;;  %s1841_s10 = int_to_ptr.vmem [resolvable:$true] %s1840_s10 }
 0x6ec   :  { %s2578_s11 = scalar_lea.vmem %s1841_s10, 64  ;;  %p2583_p1 = scmp.lt.s32.totalorder %s1841_s10, %s1841_s10 }
 0x6ed   :  { %v1052_v38 = vmax.f32 %v1050_v32, %v1051_v33  ;;  %p2579_p0 = scmp.ne.s32.totalorder %s1841_s10, %s2578_s11  ;;  %p2584_p2 = scmp.lt.s32.totalorder %s2578_s11, %s2578_s11 }
 0x6ef   :  { %v1053_v41 = vrot.slane %v1052_v38, 2  ;;  %p2585_p3 = por %p2584_p2, %p2583_p1 }
 0x6f1   :  { %v1054_v45 = vmax.f32 %v1052_v38, %v1053_v41  ;;  %p2586_p4 = pnand %p2585_p3, %p2579_p0 }
 0x6f3   :  { %v1055_v31 = vrot.slane %v1054_v45, 1 }
 0x6f5   :  { %v1056_v47 = vmax.f32 %v1054_v45, %v1055_v31 }
 0x6f7   :  { %v3120_v34 = vsel %vm418_vm7, %v712_v46, %v1056_v47  ;;  %v1288_v29 = vpop.f32.mrb[22].mxu0 }
 0x6f8   :  { %2570 = vtanh.f32 %v1288_v29  ;;  %v2271_v37 = vpop.f32.mrb[23].mxu0 }
 0x6fa   :  { %v2317_v40 = vpop.f32.mrb[8].mxu1 }
 0x6fb   :  { %2572 = vtanh.f32 %v2317_v40  ;;  %v1523_v44 = vpop.f32.mrb[9].mxu1 }
 0x6fc   :  { %2574 = vtanh.f32 %v1523_v44 }
 0x702   :  { %v2571_v49 = vpop.eup %2570 }
 0x703   :  { %1293 = vst.msk [vmem:[#allocation4 + $0xe] sm:$0x7f] %vm501_vm15, %v2571_v49 }
 0x705   :  { %v2573_v50 = vpop.eup %2572 }
 0x706   :  { %v2575_v51 = vpop.eup %2574  ;;  %1535 = vst.msk [vmem:[#allocation3 + $0x35] sm:$0x7f] %vm501_vm15, %v2573_v50 }
 0x707   :  { %1534 = vst.msk [vmem:[#allocation3 + $0x2d] sm:$0xff] %vm499_vm2, %v2575_v51 }
 0x70a   :  { %v1299_v52 = vld [vmem:[#allocation4 + $0x10] ss:$2 sm:$0x7]  ;;  %v1297_v53 = vld [vmem:[#allocation4 + $0xf] ss:$2 sm:$0x7] }
 0x70b   :  { %1305 = vrot.lane.b32.xlu1 %v1299_v52, %s2604_s24  ;;  %1301 = vrot.lane.b32.xlu0 %v1297_v53, %s2608_s26  ;;  %v1295_v58 = vld [vmem:[#allocation4 + $0xe] ss:$2 sm:$0x7] }
 0x70e   :  { %v1541_v54 = vld [vmem:[#allocation3 + $0x2f] ss:$2 sm:$0x7f]  ;;  %v1539_v55 = vld [vmem:[#allocation3 + $0x2e] ss:$2 sm:$0x7f] }
 0x70f   :  { %1547 = vrot.lane.b32.xlu1 %v1541_v54, %s2604_s24  ;;  %1543 = vrot.lane.b32.xlu0 %v1539_v55, %s2608_s26  ;;  %v1537_v63 = vld [vmem:[#allocation3 + $0x2d] ss:$2 sm:$0x7f] }
 0x77d   :  { %v1306_v56 = vpop.permute.xlu1 %1305  ;;  %v1302_v57 = vpop.permute.xlu0 %1301 }
 0x77e   :  { %v1308_v59 = vsel %vm499_vm2, %v1295_v58, %v1302_v57 }
 0x77f   :  { %v1309_v60 = vsel %vm346_vm6, %v1308_v59, %v1306_v56 }
 0x780   :  { %v1310_v61 = vsel %vm518_vm4, %v1309_v60, 1.0 }
 0x781   :  { %2287 = vmatmul.mubr.msk.f32.vlgmr.msra.gmra.mrb[24].mxu0 %vm527_vm5, %v1310_v61  ;;  %v1544_v62 = vpop.permute.xlu0 %1543  ;;  %v1548_v0 = vpop.permute.xlu1 %1547 }
 0x782   :  { %2525 = vmatpush3.bf16.msra.mxu0 %v2814_v18  ;;  %2332 = vmatprep.mubr.msk.f32.mxu0 %vm2607_vm3, %v2603_v19  ;;  %v1550_v1 = vsel %vm499_vm2, %v1537_v63, %v1544_v62  ;;  %v1559_v18 = vld [vmem:[%s3208_s3 + $0x30] sm:$0x1] }
 0x783   :  { %2526 = vmatprep.subr.bf16.mxu0 %v2606_v17  ;;  %v1551_v2 = vsel %vm346_vm6, %v1550_v1, %v1548_v0 }
 0x784   :  { %v1552_v3 = vsel %vm518_vm4, %v1551_v2, 1.0 }
 0x786   :  { %2528 = vmatpush3.bf16.msra.mxu0 %v2821_v21 }
 0x787   :  { %2529 = vmatprep.subr.bf16.mxu0 %v2606_v17 }
 0x78a   :  { %2531 = vmatpush3.bf16.msra.mxu0 %v2831_v24 }
 0x78b   :  { %2330 = vmatprep.subr.mxu0 %v2603_v19 }
 0x78e   :  { %2331 = vmatpush3.msk.msra.mxu0 %vm418_vm7, %v1559_v18 }
 0x78f   :  { %2333 = vmatmul.mubr.msk.f32.vlgmr.msra.gmra.mrb[26].mxu0 %vm527_vm5, %v1552_v3  ;;  %2532 = vmatprep.subr.bf16.mxu0 %v2606_v17 }
 0x790   :  { %2534 = vmatpush3.bf16.msra.mxu0 %v2954_v36  ;;  %2349 = vmatprep.mubr.msk.f32.mxu0 %vm2607_vm3, %v2603_v19 }
 0x791   :  { %2535 = vmatprep.subr.bf16.mxu0 %v2606_v17 }
 0x794   :  { %2537 = vmatpush3.bf16.msra.mxu0 %v2960_v39 }
 0x795   :  { %2538 = vmatprep.subr.bf16.mxu0 %v2606_v17 }
 0x798   :  { %2540 = vmatpush3.bf16.msra.mxu0 %v2970_v43  ;;  %v1661_v43 = vld [vmem:[%s3209_s4 + $0x30] sm:$0x1] }
 0x799   :  { %2347 = vmatprep.subr.mxu0 %v2603_v19  ;;  %v1749_v19 = vld [vmem:[%s3211_s6] sm:$0xf] }
 0x79c   :  { %2348 = vmatpush3.msk.msra.mxu0 %vm418_vm7, %v1661_v43  ;;  %vm1832_vm7 = vcmask 257024  }
 0x854   :  { %v1390_v21 = vpop.f32.mrb[24].mxu0 }
 0x855   :  { %v1394_v24 = vsel %vm705_vm1, %v1390_v21, -inf  ;;  %v2288_v4 = vpop.f32.mrb[25].mxu0 }
 0x856   :  { %v1395_v5 = vrot.slane %v1394_v24, 4 }
 0x858   :  { %v1396_v6 = vmax.f32 %v1394_v24, %v1395_v5 }
 0x85a   :  { %v1397_v36 = vrot.slane %v1396_v6, 2 }
 0x85c   :  { %v1398_v7 = vmax.f32 %v1396_v6, %v1397_v36 }
 0x85e   :  { %v1399_v8 = vrot.slane %v1398_v7, 1 }
 0x860   :  { %v1400_v9 = vmax.f32 %v1398_v7, %v1399_v8 }
 0x862   :  { %v1746_v10 = vsel %vm197_vm0, %v3120_v34, %v1400_v9  ;;  %v1632_v39 = vpop.f32.mrb[26].mxu0  ;;  %vm1747_vm0 = vcmask 1042432  }
 0x863   :  { %2576 = vtanh.f32 %v1632_v39  ;;  %v2334_v17 = vpop.f32.mrb[27].mxu0 }
 0x86d   :  { %v2577_v11 = vpop.eup %2576 }
 0x86e   :  { %1637 = vst.msk [vmem:[#allocation4 + $0x15] sm:$0x7f] %vm501_vm15, %v2577_v11 }
 0x875   :  { %v1643_v12 = vld [vmem:[#allocation4 + $0x17] ss:$2 sm:$0x7]  ;;  %v1641_v13 = vld [vmem:[#allocation4 + $0x16] ss:$2 sm:$0x7] }
 0x876   :  { %1649 = vrot.lane.b32.xlu1 %v1643_v12, %s2604_s24  ;;  %1645 = vrot.lane.b32.xlu0 %v1641_v13, %s2608_s26  ;;  %v1639_v20 = vld [vmem:[#allocation4 + $0x15] ss:$2 sm:$0x7] }
 0x8e8   :  { %v1650_v14 = vpop.permute.xlu1 %1649  ;;  %v1646_v15 = vpop.permute.xlu0 %1645 }
 0x8e9   :  { %v1652_v22 = vsel %vm499_vm2, %v1639_v20, %v1646_v15 }
 0x8ea   :  { %v1653_v23 = vsel %vm346_vm6, %v1652_v22, %v1650_v14  ;;  %vm1755_vm6 = vcmask 138240  }
 0x8eb   :  { %v1654_v25 = vsel %vm518_vm4, %v1653_v23, 1.0 }
 0x8ec   :  { %2350 = vmatmul.mubr.msk.f32.vlgmr.msra.gmra.mrb[28].mxu0 %vm527_vm5, %v1654_v25 }
 0x9bf   :  { %v1734_v32 = vpop.f32.mrb[28].mxu0 }
 0x9c0   :  { %v1738_v16 = vsel %vm705_vm1, %v1734_v32, -inf  ;;  %v2351_v33 = vpop.f32.mrb[29].mxu0 }
 0x9c1   :  { %v1739_v35 = vrot.slane %v1738_v16, 4 }
 0x9c3   :  { %v1740_v38 = vmax.f32 %v1738_v16, %v1739_v35 }
 0x9c5   :  { %v1741_v41 = vrot.slane %v1740_v38, 2 }
 0x9c7   :  { %v1742_v42 = vmax.f32 %v1740_v38, %v1741_v41 }
 0x9c9   :  { %v1743_v45 = vrot.slane %v1742_v42, 1 }
 0x9cb   :  { %v1744_v31 = vmax.f32 %v1742_v42, %v1743_v45 }
 0x9cd   :  { %v1748_v46 = vsel %vm1747_vm0, %v1746_v10, %v1744_v31 }
 0x9ce   :  { %v1750_v47 = vmul.f32 %v1749_v19, %v1748_v46 }
 0x9d0   :  { %v1751_v34 = vsel %vm499_vm2, %v1750_v47, 1.0 }
 0x9d1   :  { %2359 = vmatmul.mubr.msk.f32.vlgmr.msra.gmra.mrb[10].mxu1 %vm1755_vm6, %v1751_v34 }
 0xaa4   :  { %v1828_v29 = vpop.f32.mrb[10].mxu1 }
 0xaa5   :  { %1833 = vst.msk [vmem:[#allocation5] sm:$0xf] %vm1832_vm7, %v1828_v29  ;;  %v2360_v37 = vpop.f32.mrb[11].mxu1 }
 0xaa6   :  { %2589 = shalt.err (!%p2586_p4)
}
 0xaa7   :  { %s2590_s13 = scalar_lea.hbm %s3212_s7, 64 }
 0xaa8   :  { %p2591_p5 = scmp.ne.s32.totalorder %s3212_s7, %s2590_s13  ;;  %p2594_p6 = scmp.lt.u32.totalorder %s2590_s13, %s3212_s7 }
 0xaaa   :  { %p2596_p7 = pnand %p2594_p6, %p2591_p5 }
 0xaac   :  { %2599 = shalt.err (!%p2596_p7)
}
 0xaad   :  { %1843 = dma.vmem_to_hbm [thread:$0]  %s1841_s10, 64, %s3212_s7, [#allocation6]  }
 0xaae   :  { %2600 = dma.done.wait [#allocation6], 64  }
 0xaaf   :  { %2601 = vsyncadd [#allocation6], 4294967232 }
 0xab0   :  { %1847 = vsyncpa [#allocation6], 1 }

</bundles_post_ra>
